<compile_context>
chip_gen: v7x
topology: tpu7x:2x2x1
jax: 0.10.0
libtpu: 0.0.40
codegen_flags: <defaults>
</compile_context>

<pallas_src>
import jax
import jax.numpy as jnp
from jax.experimental import pallas as pl
from jax.experimental.pallas import tpu as pltpu


# ----------------------------------------------------------------------------
# Model config (matches the PyTorch module defaults)
# ----------------------------------------------------------------------------
NUM_CLASSES = 5
VECTOR_SIZE = 200  # embedding dim == input_vector_size
LAYER_SIZES = [VECTOR_SIZE, 200, 128, 128, 64, 32, 16, NUM_CLASSES]
NUM_LAYERS = len(LAYER_SIZES) - 1  # 7 Linear layers, each followed by ReLU


def _round_up(x, m):
    return ((x + m - 1) // m) * m


# Lane-padded feature widths (multiples of 128) so every tile is lane-dense.
PADDED_SIZES = [_round_up(s, 128) for s in LAYER_SIZES]  # [256,256,128,128,128,128,128,128]
IN_PAD = PADDED_SIZES[0]      # 256
OUT_PAD = PADDED_SIZES[-1]    # 128
BIAS_W = max(PADDED_SIZES)    # 256

TB_MAX = 2048                 # largest batch tile (multiple of 256)


def _pick_tb(B):
    """Batch tile size.  Floor 128 (valid bf16 tile); large B -> big tiles but
    >=4 grid steps so the pipeline has depth and v7x can shard across 2 TCs."""
    if B <= 512:
        return min(512, _round_up(B, 128))
    return int(min(TB_MAX, _round_up(pl.cdiv(B, 4), 256)))


# ----------------------------------------------------------------------------
# Pallas kernel: fused 7-layer MLP over one (TB, 256) batch tile
# ----------------------------------------------------------------------------
def _mlp_kernel(x_ref, *refs):
    """refs = (w1..w7 bf16 padded, bias_pack f32 (8,256), out_ref bf16 (TB,128))."""
    out_ref = refs[-1]
    b_ref = refs[-2]
    w_refs = refs[:-2]

    h = x_ref[...]                                   # (TB, 256) bf16
    acc = None
    for layer in range(NUM_LAYERS):
        w = w_refs[layer][...]                       # (K_pad, N_pad) bf16
        n_pad = w.shape[1]
        b = b_ref[layer:layer + 1, :n_pad]           # (1, N_pad) f32, static slice
        acc = jnp.dot(h, w, preferred_element_type=jnp.float32) + b
        acc = jnp.maximum(acc, 0.0)                  # ReLU after every Linear (incl. last)
        h = acc.astype(jnp.bfloat16)                 # bf16 operands for the next MXU pass
    out_ref[...] = acc.astype(out_ref.dtype)         # (TB, 128) bf16, lane-dense store


def fc_block_pallas(x_bf16, weights_bf16, bias_pack):
    """x_bf16: (B, 256) bf16 (lane-padded activations); returns (B, num_classes) f32."""
    B = x_bf16.shape[0]
    TB = _pick_tb(B)
    grid = (pl.cdiv(B, TB),)  # ragged last block handled by Pallas masked DMAs

    in_specs = (
        [pl.BlockSpec((TB, IN_PAD), lambda i: (i, 0))]                     # x tile
        + [pl.BlockSpec(w.shape, lambda i: (0, 0)) for w in weights_bf16]  # resident weights
        + [pl.BlockSpec(bias_pack.shape, lambda i: (0, 0))]                # resident bias pack
    )
    out = pl.pallas_call(
        _mlp_kernel,
        out_shape=jax.ShapeDtypeStruct((B, OUT_PAD), jnp.bfloat16),
        grid=grid,
        in_specs=in_specs,
        out_specs=pl.BlockSpec((TB, OUT_PAD), lambda i: (i, 0)),
        compiler_params=pltpu.CompilerParams(
            dimension_semantics=("parallel",),
            vmem_limit_bytes=32 * 1024 * 1024,
        ),
    )(x_bf16, *weights_bf16, bias_pack)
    return out[:, :NUM_CLASSES].astype(jnp.float32)


# ----------------------------------------------------------------------------
# Plain-JAX glue: EmbeddingBag(mode='mean') + flatten
# ----------------------------------------------------------------------------
def embedding_bag_mean(embedding_table, text, offsets, dtype=jnp.bfloat16):
    """PyTorch nn.EmbeddingBag(mode='mean') semantics: per-bag mean of rows."""
    n = text.shape[0]
    num_bags = offsets.shape[0]
    positions = jnp.arange(n)
    # bag id for every token: index of the last offset <= position
    seg_ids = jnp.searchsorted(offsets, positions, side="right") - 1
    emb = embedding_table[text]  # (N, D) gather
    sums = jax.ops.segment_sum(emb, seg_ids, num_segments=num_bags)
    counts = jax.ops.segment_sum(jnp.ones((n,), jnp.float32), seg_ids,
                                 num_segments=num_bags)
    mean = sums / jnp.maximum(counts, 1.0)[:, None]  # empty bag -> zeros
    return mean.astype(dtype)


@jax.jit
def forward(embedding_table_padded, weights_bf16, bias_pack, text, offsets):
    x = embedding_bag_mean(embedding_table_padded, text, offsets)  # (B, 256) bf16
    x = x.reshape(x.shape[0], -1)                                  # nn.Flatten (no-op here)
    return fc_block_pallas(x, weights_bf16, bias_pack)             # (B, num_classes) f32


# ----------------------------------------------------------------------------
# Parameter init (kaiming_normal_, mode='fan_out', relu) + host-side prep
# ----------------------------------------------------------------------------
def init_params(key):
    params = []
    for i in range(NUM_LAYERS):
        fan_in, fan_out = LAYER_SIZES[i], LAYER_SIZES[i + 1]
        key, wk, bk = jax.random.split(key, 3)
        std = (2.0 / fan_out) ** 0.5  # kaiming_normal_, mode='fan_out', relu gain
        w = std * jax.random.normal(wk, (fan_in, fan_out), jnp.float32)
        # PyTorch Linear default bias init: U(-1/sqrt(fan_in), 1/sqrt(fan_in))
        bound = 1.0 / (fan_in ** 0.5)
        b = jax.random.uniform(bk, (fan_out,), jnp.float32, -bound, bound)
        params.append((w, b))
    return params


def prepare_params(params_f32):
    """Zero-pad to lane-aligned shapes, cast weights to bf16, pack biases (8,256) f32."""
    weights_bf16 = []
    bias_pack = jnp.zeros((8, BIAS_W), jnp.float32)
    for layer, (w, b) in enumerate(params_f32):
        k_pad, n_pad = PADDED_SIZES[layer], PADDED_SIZES[layer + 1]
        wp = jnp.zeros((k_pad, n_pad), jnp.float32)
        wp = wp.at[: w.shape[0], : w.shape[1]].set(w)
        weights_bf16.append(wp.astype(jnp.bfloat16))
        bias_pack = bias_pack.at[layer, : b.shape[0]].set(b)
    return weights_bf16, bias_pack


def prepare_embeddings(embedding_table):
    """Lane-pad the frozen embedding table once: (V, 200) -> (V, 256), zero-filled."""
    d = embedding_table.shape[1]
    return jnp.pad(embedding_table, ((0, 0), (0, IN_PAD - d)))


# ----------------------------------------------------------------------------
# Pure-JAX references for sanity checking
# ----------------------------------------------------------------------------
def fc_block_ref_f32(x, params_f32):
    h = x
    for w, b in params_f32:
        h = jnp.maximum(h @ w + b[None, :], 0.0)
    return h


def fc_block_ref_bf16(x_bf16_padded, weights_bf16, bias_pack):
    """Emulates the kernel's padded bf16 math exactly (f32 MXU accum, bf16 output)."""
    h = x_bf16_padded
    acc = None
    for layer in range(NUM_LAYERS):
        w = weights_bf16[layer]
        n_pad = w.shape[1]
        acc = jnp.dot(h, w, preferred_element_type=jnp.float32) + bias_pack[layer:layer + 1, :n_pad]
        acc = jnp.maximum(acc, 0.0)
        h = acc.astype(jnp.bfloat16)
    return acc.astype(jnp.bfloat16).astype(jnp.float32)[:, :NUM_CLASSES]


if __name__ == "__main__":
    key = jax.random.PRNGKey(0)
    k_emb, k_text, k_params = jax.random.split(key, 3)

    vocab_size = 50
    batch = 4
    total_tokens = 24

    # Pretrained (frozen) embedding table, as would be passed to set_embeddings.
    embedding_table = jax.random.normal(k_emb, (vocab_size, VECTOR_SIZE), jnp.float32)
    # (text, offsets) input, PyTorch EmbeddingBag convention.
    text = jax.random.randint(k_text, (total_tokens,), 0, vocab_size, dtype=jnp.int32)
    offsets = jnp.array([0, 6, 13, 19], dtype=jnp.int32)  # 4 bags

    params_f32 = init_params(k_params)
    weights_bf16, bias_pack = prepare_params(params_f32)
    emb_padded = prepare_embeddings(embedding_table)

    out = forward(emb_padded, weights_bf16, bias_pack, text, offsets)
    out = jax.block_until_ready(out)
    assert out.shape == (batch, NUM_CLASSES), out.shape

    # Verify Pallas MLP against references.
    x_bf16 = embedding_bag_mean(emb_padded, text, offsets)                   # same kernel input
    x_f32 = embedding_bag_mean(embedding_table, text, offsets, jnp.float32)  # (B, 200) f32
    ref_bf16 = fc_block_ref_bf16(x_bf16, weights_bf16, bias_pack)            # same bf16 math
    ref_f32 = fc_block_ref_f32(x_f32, params_f32)                            # full-precision semantics
    assert jnp.allclose(out, ref_bf16, atol=2e-3, rtol=2e-3), "mismatch vs bf16 reference"
    assert jnp.allclose(out, ref_f32, atol=5e-2, rtol=5e-2), "mismatch vs f32 reference"

    print("KERNEL_OK")
</pallas_src>

<mosaic_0001>
module attributes {stable_mosaic.version = 11 : i64} {
  func.func @_mlp_kernel(%arg0: i32, %arg1: memref<128x256xbf16, #tpu.memory_space<vmem>>, %arg2: memref<256x256xbf16, #tpu.memory_space<vmem>>, %arg3: memref<256x128xbf16, #tpu.memory_space<vmem>>, %arg4: memref<128x128xbf16, #tpu.memory_space<vmem>>, %arg5: memref<128x128xbf16, #tpu.memory_space<vmem>>, %arg6: memref<128x128xbf16, #tpu.memory_space<vmem>>, %arg7: memref<128x128xbf16, #tpu.memory_space<vmem>>, %arg8: memref<128x128xbf16, #tpu.memory_space<vmem>>, %arg9: memref<8x256xf32, #tpu.memory_space<vmem>>, %arg10: memref<128x128xbf16, #tpu.memory_space<vmem>>) attributes {dimension_semantics = [#tpu.dimension_semantics<parallel>], iteration_bounds = array<i64: 1>, scalar_prefetch = 0 : i64, scratch_operands = 0 : i64, tpu.core_type = #tpu.core_type<tc>, window_params = [{transform_indices = @transform_0, window_bounds = array<i64: 128, 256>}, {pipeline_mode = #tpu.pipeline_mode<synchronous>, transform_indices = @transform_1, window_bounds = array<i64: 256, 256>}, {pipeline_mode = #tpu.pipeline_mode<synchronous>, transform_indices = @transform_2, window_bounds = array<i64: 256, 128>}, {pipeline_mode = #tpu.pipeline_mode<synchronous>, transform_indices = @transform_3, window_bounds = array<i64: 128, 128>}, {pipeline_mode = #tpu.pipeline_mode<synchronous>, transform_indices = @transform_4, window_bounds = array<i64: 128, 128>}, {pipeline_mode = #tpu.pipeline_mode<synchronous>, transform_indices = @transform_5, window_bounds = array<i64: 128, 128>}, {pipeline_mode = #tpu.pipeline_mode<synchronous>, transform_indices = @transform_6, window_bounds = array<i64: 128, 128>}, {pipeline_mode = #tpu.pipeline_mode<synchronous>, transform_indices = @transform_7, window_bounds = array<i64: 128, 128>}, {pipeline_mode = #tpu.pipeline_mode<synchronous>, transform_indices = @transform_8, window_bounds = array<i64: 8, 256>}, {transform_indices = @transform_9, window_bounds = array<i64: 128, 128>}]} {
    %c0 = arith.constant 0 : index
    %c0_0 = arith.constant 0 : index
    %0 = vector.load %arg1[%c0, %c0_0] : memref<128x256xbf16, #tpu.memory_space<vmem>>, vector<128x256xbf16>
    %c0_1 = arith.constant 0 : index
    %c0_2 = arith.constant 0 : index
    %1 = vector.load %arg2[%c0_1, %c0_2] : memref<256x256xbf16, #tpu.memory_space<vmem>>, vector<256x256xbf16>
    %c0_3 = arith.constant 0 : index
    %c0_4 = arith.constant 0 : index
    %2 = vector.load %arg9[%c0_3, %c0_4] : memref<8x256xf32, #tpu.memory_space<vmem>>, vector<1x256xf32>
    %cst = arith.constant dense<0.000000e+00> : vector<128x256xf32>
    %3 = tpu.matmul %0, %1, %cst {dimension_numbers = #tpu.dot_dimension_numbers<[1], [0], [0], [1], [0, 0, 1, 1], [], []>} : vector<128x256xbf16>, vector<256x256xbf16>, vector<128x256xf32> -> vector<128x256xf32>
    %4 = vector.broadcast %2 : vector<1x256xf32> to vector<128x256xf32>
    %5 = arith.addf %3, %4 : vector<128x256xf32>
    %cst_5 = arith.constant 0.000000e+00 : f32
    %6 = vector.broadcast %cst_5 : f32 to vector<128x256xf32>
    %7 = arith.maximumf %5, %6 : vector<128x256xf32>
    %8 = arith.truncf %7 : vector<128x256xf32> to vector<128x256xbf16>
    %c0_6 = arith.constant 0 : index
    %c0_7 = arith.constant 0 : index
    %9 = vector.load %arg3[%c0_6, %c0_7] : memref<256x128xbf16, #tpu.memory_space<vmem>>, vector<256x128xbf16>
    %c1 = arith.constant 1 : index
    %c0_8 = arith.constant 0 : index
    %10 = vector.load %arg9[%c1, %c0_8] : memref<8x256xf32, #tpu.memory_space<vmem>>, vector<1x128xf32>
    %cst_9 = arith.constant dense<0.000000e+00> : vector<128x128xf32>
    %11 = tpu.matmul %8, %9, %cst_9 {dimension_numbers = #tpu.dot_dimension_numbers<[1], [0], [0], [1], [0, 0, 1, 1], [], []>} : vector<128x256xbf16>, vector<256x128xbf16>, vector<128x128xf32> -> vector<128x128xf32>
    %12 = vector.broadcast %10 : vector<1x128xf32> to vector<128x128xf32>
    %13 = arith.addf %11, %12 : vector<128x128xf32>
    %cst_10 = arith.constant 0.000000e+00 : f32
    %14 = vector.broadcast %cst_10 : f32 to vector<128x128xf32>
    %15 = arith.maximumf %13, %14 : vector<128x128xf32>
    %16 = arith.truncf %15 : vector<128x128xf32> to vector<128x128xbf16>
    %c0_11 = arith.constant 0 : index
    %c0_12 = arith.constant 0 : index
    %17 = vector.load %arg4[%c0_11, %c0_12] : memref<128x128xbf16, #tpu.memory_space<vmem>>, vector<128x128xbf16>
    %c2 = arith.constant 2 : index
    %c0_13 = arith.constant 0 : index
    %18 = vector.load %arg9[%c2, %c0_13] : memref<8x256xf32, #tpu.memory_space<vmem>>, vector<1x128xf32>
    %cst_14 = arith.constant dense<0.000000e+00> : vector<128x128xf32>
    %19 = tpu.matmul %16, %17, %cst_14 {dimension_numbers = #tpu.dot_dimension_numbers<[1], [0], [0], [1], [0, 0, 1, 1], [], []>} : vector<128x128xbf16>, vector<128x128xbf16>, vector<128x128xf32> -> vector<128x128xf32>
    %20 = vector.broadcast %18 : vector<1x128xf32> to vector<128x128xf32>
    %21 = arith.addf %19, %20 : vector<128x128xf32>
    %cst_15 = arith.constant 0.000000e+00 : f32
    %22 = vector.broadcast %cst_15 : f32 to vector<128x128xf32>
    %23 = arith.maximumf %21, %22 : vector<128x128xf32>
    %24 = arith.truncf %23 : vector<128x128xf32> to vector<128x128xbf16>
    %c0_16 = arith.constant 0 : index
    %c0_17 = arith.constant 0 : index
    %25 = vector.load %arg5[%c0_16, %c0_17] : memref<128x128xbf16, #tpu.memory_space<vmem>>, vector<128x128xbf16>
    %c3 = arith.constant 3 : index
    %c0_18 = arith.constant 0 : index
    %26 = vector.load %arg9[%c3, %c0_18] : memref<8x256xf32, #tpu.memory_space<vmem>>, vector<1x128xf32>
    %cst_19 = arith.constant dense<0.000000e+00> : vector<128x128xf32>
    %27 = tpu.matmul %24, %25, %cst_19 {dimension_numbers = #tpu.dot_dimension_numbers<[1], [0], [0], [1], [0, 0, 1, 1], [], []>} : vector<128x128xbf16>, vector<128x128xbf16>, vector<128x128xf32> -> vector<128x128xf32>
    %28 = vector.broadcast %26 : vector<1x128xf32> to vector<128x128xf32>
    %29 = arith.addf %27, %28 : vector<128x128xf32>
    %cst_20 = arith.constant 0.000000e+00 : f32
    %30 = vector.broadcast %cst_20 : f32 to vector<128x128xf32>
    %31 = arith.maximumf %29, %30 : vector<128x128xf32>
    %32 = arith.truncf %31 : vector<128x128xf32> to vector<128x128xbf16>
    %c0_21 = arith.constant 0 : index
    %c0_22 = arith.constant 0 : index
    %33 = vector.load %arg6[%c0_21, %c0_22] : memref<128x128xbf16, #tpu.memory_space<vmem>>, vector<128x128xbf16>
    %c4 = arith.constant 4 : index
    %c0_23 = arith.constant 0 : index
    %34 = vector.load %arg9[%c4, %c0_23] : memref<8x256xf32, #tpu.memory_space<vmem>>, vector<1x128xf32>
    %cst_24 = arith.constant dense<0.000000e+00> : vector<128x128xf32>
    %35 = tpu.matmul %32, %33, %cst_24 {dimension_numbers = #tpu.dot_dimension_numbers<[1], [0], [0], [1], [0, 0, 1, 1], [], []>} : vector<128x128xbf16>, vector<128x128xbf16>, vector<128x128xf32> -> vector<128x128xf32>
    %36 = vector.broadcast %34 : vector<1x128xf32> to vector<128x128xf32>
    %37 = arith.addf %35, %36 : vector<128x128xf32>
    %cst_25 = arith.constant 0.000000e+00 : f32
    %38 = vector.broadcast %cst_25 : f32 to vector<128x128xf32>
    %39 = arith.maximumf %37, %38 : vector<128x128xf32>
    %40 = arith.truncf %39 : vector<128x128xf32> to vector<128x128xbf16>
    %c0_26 = arith.constant 0 : index
    %c0_27 = arith.constant 0 : index
    %41 = vector.load %arg7[%c0_26, %c0_27] : memref<128x128xbf16, #tpu.memory_space<vmem>>, vector<128x128xbf16>
    %c5 = arith.constant 5 : index
    %c0_28 = arith.constant 0 : index
    %42 = vector.load %arg9[%c5, %c0_28] : memref<8x256xf32, #tpu.memory_space<vmem>>, vector<1x128xf32>
    %cst_29 = arith.constant dense<0.000000e+00> : vector<128x128xf32>
    %43 = tpu.matmul %40, %41, %cst_29 {dimension_numbers = #tpu.dot_dimension_numbers<[1], [0], [0], [1], [0, 0, 1, 1], [], []>} : vector<128x128xbf16>, vector<128x128xbf16>, vector<128x128xf32> -> vector<128x128xf32>
    %44 = vector.broadcast %42 : vector<1x128xf32> to vector<128x128xf32>
    %45 = arith.addf %43, %44 : vector<128x128xf32>
    %cst_30 = arith.constant 0.000000e+00 : f32
    %46 = vector.broadcast %cst_30 : f32 to vector<128x128xf32>
    %47 = arith.maximumf %45, %46 : vector<128x128xf32>
    %48 = arith.truncf %47 : vector<128x128xf32> to vector<128x128xbf16>
    %c0_31 = arith.constant 0 : index
    %c0_32 = arith.constant 0 : index
    %49 = vector.load %arg8[%c0_31, %c0_32] : memref<128x128xbf16, #tpu.memory_space<vmem>>, vector<128x128xbf16>
    %c6 = arith.constant 6 : index
    %c0_33 = arith.constant 0 : index
    %50 = vector.load %arg9[%c6, %c0_33] : memref<8x256xf32, #tpu.memory_space<vmem>>, vector<1x128xf32>
    %cst_34 = arith.constant dense<0.000000e+00> : vector<128x128xf32>
    %51 = tpu.matmul %48, %49, %cst_34 {dimension_numbers = #tpu.dot_dimension_numbers<[1], [0], [0], [1], [0, 0, 1, 1], [], []>} : vector<128x128xbf16>, vector<128x128xbf16>, vector<128x128xf32> -> vector<128x128xf32>
    %52 = vector.broadcast %50 : vector<1x128xf32> to vector<128x128xf32>
    %53 = arith.addf %51, %52 : vector<128x128xf32>
    %cst_35 = arith.constant 0.000000e+00 : f32
    %54 = vector.broadcast %cst_35 : f32 to vector<128x128xf32>
    %55 = arith.maximumf %53, %54 : vector<128x128xf32>
    %56 = arith.truncf %55 : vector<128x128xf32> to vector<128x128xbf16>
    %c0_36 = arith.constant 0 : index
    %c0_37 = arith.constant 0 : index
    %57 = vector.load %arg10[%c0_36, %c0_37] : memref<128x128xbf16, #tpu.memory_space<vmem>>, vector<128x128xbf16>
    tpu.vector_store %arg10[%c0_36, %c0_37], %56 {strides = array<i32>} : memref<128x128xbf16, #tpu.memory_space<vmem>>, vector<128x128xbf16>,
    return
  }
  func.func @transform_0(%arg0: i32) -> (i32, i32) {
    %c0_i32 = arith.constant 0 : i32
    %c0_i32_0 = arith.constant 0 : i32
    return %arg0, %c0_i32 : i32, i32
  }
  func.func @transform_1(%arg0: i32) -> (i32, i32) {
    %c0_i32 = arith.constant 0 : i32
    %c0_i32_0 = arith.constant 0 : i32
    %c0_i32_1 = arith.constant 0 : i32
    return %c0_i32, %c0_i32_0 : i32, i32
  }
  func.func @transform_2(%arg0: i32) -> (i32, i32) {
    %c0_i32 = arith.constant 0 : i32
    %c0_i32_0 = arith.constant 0 : i32
    %c0_i32_1 = arith.constant 0 : i32
    return %c0_i32, %c0_i32_0 : i32, i32
  }
  func.func @transform_3(%arg0: i32) -> (i32, i32) {
    %c0_i32 = arith.constant 0 : i32
    %c0_i32_0 = arith.constant 0 : i32
    %c0_i32_1 = arith.constant 0 : i32
    return %c0_i32, %c0_i32_0 : i32, i32
  }
  func.func @transform_4(%arg0: i32) -> (i32, i32) {
    %c0_i32 = arith.constant 0 : i32
    %c0_i32_0 = arith.constant 0 : i32
    %c0_i32_1 = arith.constant 0 : i32
    return %c0_i32, %c0_i32_0 : i32, i32
  }
  func.func @transform_5(%arg0: i32) -> (i32, i32) {
    %c0_i32 = arith.constant 0 : i32
    %c0_i32_0 = arith.constant 0 : i32
    %c0_i32_1 = arith.constant 0 : i32
    return %c0_i32, %c0_i32_0 : i32, i32
  }
  func.func @transform_6(%arg0: i32) -> (i32, i32) {
    %c0_i32 = arith.constant 0 : i32
    %c0_i32_0 = arith.constant 0 : i32
    %c0_i32_1 = arith.constant 0 : i32
    return %c0_i32, %c0_i32_0 : i32, i32
  }
  func.func @transform_7(%arg0: i32) -> (i32, i32) {
    %c0_i32 = arith.constant 0 : i32
    %c0_i32_0 = arith.constant 0 : i32
    %c0_i32_1 = arith.constant 0 : i32
    return %c0_i32, %c0_i32_0 : i32, i32
  }
  func.func @transform_8(%arg0: i32) -> (i32, i32) {
    %c0_i32 = arith.constant 0 : i32
    %c0_i32_0 = arith.constant 0 : i32
    %c0_i32_1 = arith.constant 0 : i32
    return %c0_i32, %c0_i32_0 : i32, i32
  }
  func.func @transform_9(%arg0: i32) -> (i32, i32) {
    %c0_i32 = arith.constant 0 : i32
    %c0_i32_0 = arith.constant 0 : i32
    return %arg0, %c0_i32 : i32, i32
  }
}

</mosaic_0001>

<bundles_post_ra>
// kernel: custom-call
= control target key start
LH: loop header
LB: loop body
LE: loop exit
PB: predicated region body
PF: predicated region fallthrough
CT: control target
= control target key end

     0   :  { %s6_s0 = inlined_call_operand.vmem [shape: u32[24], index: 0, kind: output, shape index: {}]  }

// kernel: forward.1
= control target key start
LH: loop header
LB: loop body
LE: loop exit
PB: predicated region body
PF: predicated region fallthrough
CT: control target
= control target key end

     0   :  { %14 = vsyncpa [#allocation3], 0  ;;  %s3171_s0 = inlined_call_operand.vmem [shape: bf16[4,256], index: 0, kind: input, shape index: {}]   ;;  %s3172_s1 = inlined_call_operand.hbm [shape: bf16[256,256], index: 1, kind: input, shape index: {}]   ;;  %s3173_s2 = inlined_call_operand.vmem [shape: bf16[256,128], index: 2, kind: input, shape index: {}]   ;;  %s3174_s3 = inlined_call_operand.hbm [shape: bf16[128,128], index: 3, kind: input, shape index: {}]   ;;  %s3175_s4 = inlined_call_operand.hbm [shape: bf16[128,128], index: 4, kind: input, shape index: {}]   ;;  %s3176_s5 = inlined_call_operand.hbm [shape: bf16[128,128], index: 5, kind: input, shape index: {}]   ;;  %s3177_s6 = inlined_call_operand.hbm [shape: bf16[128,128], index: 6, kind: input, shape index: {}]   ;;  %s3178_s7 = inlined_call_operand.hbm [shape: bf16[128,128], index: 7, kind: input, shape index: {}]   ;;  %s3179_s8 = inlined_call_operand.vmem [shape: f32[8,256], index: 8, kind: input, shape index: {}]   ;;  %s3180_s9 = inlined_call_operand.vmem [shape: bf16[4,128], index: 9, kind: output, shape index: {}]  }
   0x1   :  { %15 = vsyncpa [#allocation5], 0 }
   0x2   :  { %16 = vsyncpa [#allocation8], 0 }
   0x3   :  { %17 = vsyncpa [#allocation11], 0  ;;  %s2838_s30 = smov [#allocation4]   ;;  %s2698_s13 = scalar_lea.hbm %s3174_s3, 1024 }
   0x4   :  { %s39_s10 = sshll.u32 %s2838_s30, 4  ;;  %p2699_p0 = scmp.ne.s32.totalorder %s3174_s3, %s2698_s13  ;;  %s40_s10 = int_to_ptr.vmem [resolvable:$true] %s39_s10 }
   0x5   :  { %p2702_p1 = scmp.lt.u32.totalorder %s2698_s13, %s3174_s3 }
   0x7   :  { %p2704_p2 = pnand %p2702_p1, %p2699_p0 }
   0x9   :  { %2707 = shalt.err (!%p2704_p2)
}
   0xa   :  { %s2708_s18 = scalar_lea.vmem %s40_s10, 1024  ;;  %p2713_p4 = scmp.lt.s32.totalorder %s40_s10, %s40_s10 }
   0xb   :  { %p2709_p3 = scmp.ne.s32.totalorder %s40_s10, %s2708_s18  ;;  %p2714_p5 = scmp.lt.s32.totalorder %s2708_s18, %s2708_s18 }
   0xd   :  { %p2715_p6 = por %p2714_p5, %p2713_p4 }
   0xf   :  { %p2716_p7 = pnand %p2715_p6, %p2709_p3 }
  0x11   :  { %2719 = shalt.err (!%p2716_p7)
}
  0x12   :  { %s2839_s19 = smov 64   ;;  %s2840_s20 = smov 4  }
  0x13   :  { %45 = dma.hbm_to_vmem [thread:$0]  %s3174_s3, 1024, %s40_s10, [#allocation5], %s2839_s19, %s2839_s19, %s2840_s20  }
  0x14   :  { %s2841_s23 = smov [#allocation7]   ;;  %s2842_s25 = smov [#allocation2]  }
  0x15   :  { %s63_s24 = sshll.u32 %s2841_s23, 4  ;;  %s25_s26 = sshll.u32 %s2842_s25, 4  ;;  %s64_s24 = int_to_ptr.vmem [resolvable:$true] %s63_s24  ;;  %s26_s26 = int_to_ptr.vmem [resolvable:$true] %s25_s26 }
  0x16   :  { %s2720_s29 = scalar_lea.hbm %s3176_s5, 1024 }
  0x17   :  { %p2721_p8 = scmp.ne.s32.totalorder %s3176_s5, %s2720_s29  ;;  %p2724_p9 = scmp.lt.u32.totalorder %s2720_s29, %s3176_s5 }
  0x19   :  { %p2726_p10 = pnand %p2724_p9, %p2721_p8 }
  0x1b   :  { %2729 = shalt.err (!%p2726_p10)
}
  0x1c   :  { %s2730_s3 = scalar_lea.vmem %s64_s24, 1024  ;;  %p2735_p12 = scmp.lt.s32.totalorder %s64_s24, %s64_s24 }
  0x1d   :  { %p2731_p11 = scmp.ne.s32.totalorder %s64_s24, %s2730_s3  ;;  %p2736_p13 = scmp.lt.s32.totalorder %s2730_s3, %s2730_s3 }
  0x1f   :  { %p2737_p0 = por %p2736_p13, %p2735_p12 }
  0x21   :  { %p2738_p1 = pnand %p2737_p0, %p2731_p11 }
  0x23   :  { %2741 = shalt.err (!%p2738_p1)
}
  0x24   :  { %69 = dma.hbm_to_vmem [thread:$0]  %s3176_s5, 1024, %s64_s24, [#allocation8], %s2839_s19, %s2839_s19, %s2840_s20  }
  0x25   :  { %s2742_s17 = scalar_lea.hbm %s3172_s1, 4096 }
  0x26   :  { %p2743_p2 = scmp.ne.s32.totalorder %s3172_s1, %s2742_s17  ;;  %p2746_p3 = scmp.lt.u32.totalorder %s2742_s17, %s3172_s1 }
  0x28   :  { %p2748_p4 = pnand %p2746_p3, %p2743_p2 }
  0x2a   :  { %2751 = shalt.err (!%p2748_p4)
}
  0x2b   :  { %s2752_s25 = scalar_lea.vmem %s26_s26, 4096  ;;  %p2757_p6 = scmp.lt.s32.totalorder %s26_s26, %s26_s26 }
  0x2c   :  { %p2753_p5 = scmp.ne.s32.totalorder %s26_s26, %s2752_s25  ;;  %p2758_p7 = scmp.lt.s32.totalorder %s2752_s25, %s2752_s25 }
  0x2e   :  { %p2759_p8 = por %p2758_p7, %p2757_p6 }
  0x30   :  { %p2760_p9 = pnand %p2759_p8, %p2753_p5 }
  0x32   :  { %2763 = shalt.err (!%p2760_p9)
}
  0x33   :  { %s2843_s5 = smov 128   ;;  %s2844_s24 = smov 8  }
  0x34   :  { %31 = dma.hbm_to_vmem [thread:$0]  %s3172_s1, 4096, %s26_s26, [#allocation3], %s2843_s5, %s2843_s5, %s2844_s24  }
  0x35   :  { %s2845_s29 = smov [#allocation6]   ;;  %s2846_s11 = smov [#allocation9]  }
  0x36   :  { %s51_s30 = sshll.u32 %s2845_s29, 4  ;;  %s75_s12 = sshll.u32 %s2846_s11, 4  ;;  %s52_s30 = int_to_ptr.vmem [resolvable:$true] %s51_s30  ;;  %s76_s12 = int_to_ptr.vmem [resolvable:$true] %s75_s12 }
  0x37   :  { %s2764_s10 = scalar_lea.hbm %s3175_s4, 1024 }
  0x38   :  { %p2765_p10 = scmp.ne.s32.totalorder %s3175_s4, %s2764_s10  ;;  %p2768_p11 = scmp.lt.u32.totalorder %s2764_s10, %s3175_s4 }
  0x3a   :  { %p2770_p12 = pnand %p2768_p11, %p2765_p10 }
  0x3c   :  { %2773 = shalt.err (!%p2770_p12)
}
  0x3d   :  { %s2774_s1 = scalar_lea.vmem %s52_s30, 1024  ;;  %p2779_p0 = scmp.lt.s32.totalorder %s52_s30, %s52_s30 }
  0x3e   :  { %p2775_p13 = scmp.ne.s32.totalorder %s52_s30, %s2774_s1  ;;  %p2780_p1 = scmp.lt.s32.totalorder %s2774_s1, %s2774_s1 }
  0x40   :  { %p2781_p2 = por %p2780_p1, %p2779_p0 }
  0x42   :  { %p2782_p3 = pnand %p2781_p2, %p2775_p13 }
  0x44   :  { %2785 = shalt.err (!%p2782_p3)
}
  0x45   :  { %57 = dma.hbm_to_vmem [thread:$0]  %s3175_s4, 1024, %s52_s30, [#allocation5], %s2839_s19, %s2839_s19, %s2840_s20  }
  0x46   :  { %s2786_s23 = scalar_lea.hbm %s3177_s6, 1024 }
  0x47   :  { %p2787_p4 = scmp.ne.s32.totalorder %s3177_s6, %s2786_s23  ;;  %p2790_p5 = scmp.lt.u32.totalorder %s2786_s23, %s3177_s6 }
  0x49   :  { %p2792_p6 = pnand %p2790_p5, %p2787_p4 }
  0x4b   :  { %2795 = shalt.err (!%p2792_p6)
}
  0x4c   :  { %s2796_s28 = scalar_lea.vmem %s76_s12, 1024  ;;  %p2801_p8 = scmp.lt.s32.totalorder %s76_s12, %s76_s12 }
  0x4d   :  { %p2797_p7 = scmp.ne.s32.totalorder %s76_s12, %s2796_s28  ;;  %p2802_p9 = scmp.lt.s32.totalorder %s2796_s28, %s2796_s28 }
  0x4f   :  { %p2803_p10 = por %p2802_p9, %p2801_p8 }
  0x51   :  { %p2804_p11 = pnand %p2803_p10, %p2797_p7 }
  0x53   :  { %2807 = shalt.err (!%p2804_p11)
}
  0x54   :  { %81 = dma.hbm_to_vmem [thread:$0]  %s3177_s6, 1024, %s76_s12, [#allocation8], %s2839_s19, %s2839_s19, %s2840_s20  }
  0x55   :  { %s2847_s30 = smov [#allocation10]   ;;  %s2808_s10 = scalar_lea.hbm %s3178_s7, 1024 }
  0x56   :  { %s87_s11 = sshll.u32 %s2847_s30, 4  ;;  %p2809_p12 = scmp.ne.s32.totalorder %s3178_s7, %s2808_s10  ;;  %s88_s11 = int_to_ptr.vmem [resolvable:$true] %s87_s11 }
  0x57   :  { %p2812_p13 = scmp.lt.u32.totalorder %s2808_s10, %s3178_s7 }
  0x59   :  { %p2814_p0 = pnand %p2812_p13, %p2809_p12 }
  0x5b   :  { %2817 = shalt.err (!%p2814_p0)
}
  0x5c   :  { %s2818_s1 = scalar_lea.vmem %s88_s11, 1024  ;;  %p2823_p2 = scmp.lt.s32.totalorder %s88_s11, %s88_s11 }
  0x5d   :  { %p2819_p1 = scmp.ne.s32.totalorder %s88_s11, %s2818_s1  ;;  %p2824_p3 = scmp.lt.s32.totalorder %s2818_s1, %s2818_s1 }
  0x5f   :  { %p2825_p4 = por %p2824_p3, %p2823_p2 }
  0x61   :  { %p2826_p5 = pnand %p2825_p4, %p2819_p1 }
  0x63   :  { %2829 = shalt.err (!%p2826_p5)
}
  0x64   :  { %93 = dma.hbm_to_vmem [thread:$0]  %s3178_s7, 1024, %s88_s11, [#allocation11], %s2839_s19, %s2839_s19, %s2840_s20  }
  0x65   :  { %2830 = dma.done.wait [#allocation3], 4096  }
  0x66   :  { %2831 = vsyncadd [#allocation3], 4294963200 }
  0x67   :  { %2832 = dma.done.wait [#allocation5], 2048  }
  0x68   :  { %2833 = vsyncadd [#allocation5], 4294965248 }
  0x69   :  { %2834 = dma.done.wait [#allocation8], 2048  }
  0x6a   :  { %2835 = vsyncadd [#allocation8], 4294965248 }
  0x6b   :  { %2836 = dma.done.wait [#allocation11], 1024  }
  0x6c   :  { %2837 = vsyncadd [#allocation11], 4294966272  ;;  %v2562_v0 = vld [vmem:[#allocation2 + $0x4] ss:$8 sps:$4 sm:$0xff]   ;;  %v2564_v1 = vld [vmem:[#allocation2] ss:$8 sps:$4 sm:$0xff]   ;;  %v181_v9 = vlaneseq }
  0x6d   :  { %543 = vmatprep.subr.bf16.mxu0 %v2562_v0  ;;  %v2565_v2 = vld [vmem:[#allocation2 + $0x14] ss:$8 sps:$4 sm:$0xff]   ;;  %v2567_v3 = vld [vmem:[#allocation2 + $0x10] ss:$8 sps:$4 sm:$0xff]   ;;  %v2568_v4 = vld [vmem:[#allocation2 + $0x24] ss:$8 sps:$4 sm:$0xff]  }
  0x6e   :  { %544 = vmatpush1.bf16.msra.mxu0 %v2564_v1  ;;  %v2570_v5 = vld [vmem:[#allocation2 + $0x20] ss:$8 sps:$4 sm:$0xff]   ;;  %v2571_v6 = vld [vmem:[#allocation2 + $0x34] ss:$8 sps:$4 sm:$0xff]   ;;  %v2573_v7 = vld [vmem:[#allocation2 + $0x30] ss:$8 sps:$4 sm:$0xff]  }
  0x6f   :  { %545 = vmatprep.subr.bf16.mxu0 %v2565_v2  ;;  %v2574_v8 = vld [vmem:[#allocation2 + $0x44] ss:$8 sps:$4 sm:$0xff]   ;;  %v2576_v10 = vld [vmem:[#allocation2 + $0x40] ss:$8 sps:$4 sm:$0xff]   ;;  %v2577_v11 = vld [vmem:[#allocation2 + $0x54] ss:$8 sps:$4 sm:$0xff]  }
  0x70   :  { %v2985_v12 = vshrl.u32 %v181_v9, 7  ;;  %v2579_v13 = vld [vmem:[#allocation2 + $0x50] ss:$8 sps:$4 sm:$0xff]   ;;  %v2580_v14 = vld [vmem:[#allocation2 + $0x64] ss:$8 sps:$4 sm:$0xff]  }
  0x71   :  { %v2582_v15 = vld [vmem:[#allocation2 + $0x60] ss:$8 sps:$4 sm:$0xff]   ;;  %v2583_v18 = vld [vmem:[#allocation2 + $0x74] ss:$8 sps:$4 sm:$0xff]   ;;  %v2585_v19 = vld [vmem:[#allocation2 + $0x70] ss:$8 sps:$4 sm:$0xff]  }
  0x72   :  { %546 = vmatpush1.bf16.msra.mxu0 %v2567_v3  ;;  %v2990_v16 = vld.sshfl [vmem:[%s3171_s0] sm:$0xff pattern:$0x76325410]  ;;  %v2995_v17 = vld.sshfl [vmem:[%s3171_s0 + $0x8] sm:$0xff pattern:$0x76325410] }
  0x73   :  { %547 = vmatprep.subr.bf16.mxu0 %v2568_v4  ;;  %v240_v20 = vcombine.high %v2990_v16, %v2995_v17  ;;  %v2586_v21 = vld [vmem:[#allocation2 + $0x84] ss:$8 sps:$4 sm:$0xff]   ;;  %v2588_v22 = vld [vmem:[#allocation2 + $0x80] ss:$8 sps:$4 sm:$0xff]   ;;  %v2589_v23 = vld [vmem:[#allocation2 + $0x94] ss:$8 sps:$4 sm:$0xff]   ;;  %v239_v52 = vcombine.low %v2990_v16, %v2995_v17 }
  0x74   :  { %v2591_v24 = vld [vmem:[#allocation2 + $0x90] ss:$8 sps:$4 sm:$0xff]   ;;  %v2592_v25 = vld [vmem:[#allocation2 + $0xa4] ss:$8 sps:$4 sm:$0xff]   ;;  %v2594_v26 = vld [vmem:[#allocation2 + $0xa0] ss:$8 sps:$4 sm:$0xff]  }
  0x75   :  { %575 = vmatprep.mubr.bf16.mxu0 %v240_v20  ;;  %v2595_v27 = vld [vmem:[#allocation2 + $0xb4] ss:$8 sps:$4 sm:$0xff]   ;;  %v2626_v28 = vld [vmem:[%s3173_s2 + $0x40] sm:$0xff]   ;;  %v2628_v30 = vld [vmem:[%s3173_s2 + $0x48] sm:$0xff]   ;;  %v183_v20 = vsub.s32 0, %v2985_v12 }
  0x76   :  { %548 = vmatpush1.bf16.msra.mxu0 %v2570_v5  ;;  %v2627_v29 = vld [vmem:[%s3173_s2] sm:$0xff]   ;;  %2247 = vmatprep.subr.bf16.mxu1 %v2626_v28  ;;  %v2629_v31 = vld [vmem:[%s3173_s2 + $0x8] sm:$0xff]   ;;  %v2630_v32 = vld [vmem:[%s3173_s2 + $0x50] sm:$0xff]  }
  0x77   :  { %549 = vmatprep.subr.bf16.mxu0 %v2571_v6  ;;  %2248 = vmatpush3.bf16.msra.mxu1 %v2627_v29  ;;  %v2597_v33 = vld [vmem:[#allocation2 + $0xb0] ss:$8 sps:$4 sm:$0xff]   ;;  %v2598_v34 = vld [vmem:[#allocation2 + $0xc4] ss:$8 sps:$4 sm:$0xff]   ;;  %v2600_v35 = vld [vmem:[#allocation2 + $0xc0] ss:$8 sps:$4 sm:$0xff]  }
  0x78   :  { %2249 = vmatprep.subr.bf16.mxu1 %v2628_v30  ;;  %v2631_v36 = vld [vmem:[%s3173_s2 + $0x10] sm:$0xff]   ;;  %v2632_v37 = vld [vmem:[%s3173_s2 + $0x58] sm:$0xff]   ;;  %v2634_v40 = vld [vmem:[%s3173_s2 + $0x60] sm:$0xff]  }
  0x79   :  { %v2601_v38 = vld [vmem:[#allocation2 + $0xd4] ss:$8 sps:$4 sm:$0xff]   ;;  %v2603_v41 = vld [vmem:[#allocation2 + $0xd0] ss:$8 sps:$4 sm:$0xff]   ;;  %v2604_v42 = vld [vmem:[#allocation2 + $0xe4] ss:$8 sps:$4 sm:$0xff]  }
  0x7a   :  { %550 = vmatpush1.bf16.msra.mxu0 %v2573_v7  ;;  %v2633_v39 = vld [vmem:[%s3173_s2 + $0x18] sm:$0xff]   ;;  %v2635_v43 = vld [vmem:[%s3173_s2 + $0x20] sm:$0xff]   ;;  %v2636_v44 = vld [vmem:[%s3173_s2 + $0x68] sm:$0xff]  }
  0x7b   :  { %551 = vmatprep.subr.bf16.mxu0 %v2574_v8  ;;  %2250 = vmatpush3.bf16.msra.mxu1 %v2629_v31  ;;  %v2606_v45 = vld [vmem:[#allocation2 + $0xe0] ss:$8 sps:$4 sm:$0xff]   ;;  %v2684_v46 = vld.sshfl [vmem:[%s3171_s0 + $0x10] sm:$0xff pattern:$0x76325410]  ;;  %v2640_v17 = vld [vmem:[%s3173_s2 + $0x78] sm:$0xff]  }
  0x7c   :  { %2251 = vmatprep.subr.bf16.mxu1 %v2630_v32  ;;  %v2685_v47 = vld.sshfl [vmem:[%s3171_s0 + $0x18] sm:$0xff pattern:$0x76325410]  ;;  %v2686_v50 = vld.sshfl [vmem:[%s3171_s0 + $0x20] sm:$0xff pattern:$0x76325410] }
  0x7d   :  { %v2607_v48 = vld [vmem:[#allocation2 + $0xf4] ss:$8 sps:$4 sm:$0xff]   ;;  %v2609_v49 = vld [vmem:[#allocation2 + $0xf0] ss:$8 sps:$4 sm:$0xff]   ;;  %v258_v53 = vcombine.high %v2684_v46, %v2685_v47  ;;  %v257_v56 = vcombine.low %v2684_v46, %v2685_v47 }
  0x7e   :  { %552 = vmatpush1.bf16.msra.mxu0 %v2576_v10  ;;  %v2687_v51 = vld.sshfl [vmem:[%s3171_s0 + $0x28] sm:$0xff pattern:$0x76325410]  ;;  %v2688_v54 = vld.sshfl [vmem:[%s3171_s0 + $0x30] sm:$0xff pattern:$0x76325410] }
  0x7f   :  { %553 = vmatprep.subr.bf16.mxu0 %v2577_v11  ;;  %2252 = vmatpush3.bf16.msra.mxu1 %v2631_v36  ;;  %v2689_v55 = vld.sshfl [vmem:[%s3171_s0 + $0x38] sm:$0xff pattern:$0x76325410]  ;;  %v276_v57 = vcombine.high %v2686_v50, %v2687_v51  ;;  %v275_v58 = vcombine.low %v2686_v50, %v2687_v51  ;;  %v2690_v60 = vld.sshfl [vmem:[%s3171_s0 + $0x40] sm:$0xff pattern:$0x76325410] }
  0x80   :  { %2253 = vmatprep.subr.bf16.mxu1 %v2632_v37  ;;  %v294_v59 = vcombine.high %v2688_v54, %v2689_v55  ;;  %v2691_v61 = vld.sshfl [vmem:[%s3171_s0 + $0x48] sm:$0xff pattern:$0x76325410]  ;;  %v293_v62 = vcombine.low %v2688_v54, %v2689_v55  ;;  %v2692_v0 = vld.sshfl [vmem:[%s3171_s0 + $0x50] sm:$0xff pattern:$0x76325410] }
  0x81   :  { %v312_v63 = vcombine.high %v2690_v60, %v2691_v61  ;;  %v2693_v1 = vld.sshfl [vmem:[%s3171_s0 + $0x58] sm:$0xff pattern:$0x76325410]  ;;  %v311_v2 = vcombine.low %v2690_v60, %v2691_v61  ;;  %v2694_v4 = vld.sshfl [vmem:[%s3171_s0 + $0x60] sm:$0xff pattern:$0x76325410] }
  0x82   :  { %554 = vmatpush1.bf16.msra.mxu0 %v2579_v13  ;;  %v330_v3 = vcombine.high %v2692_v0, %v2693_v1  ;;  %v2695_v5 = vld.sshfl [vmem:[%s3171_s0 + $0x68] sm:$0xff pattern:$0x76325410]  ;;  %v329_v6 = vcombine.low %v2692_v0, %v2693_v1  ;;  %v2696_v8 = vld.sshfl [vmem:[%s3171_s0 + $0x70] sm:$0xff pattern:$0x76325410] }
  0x83   :  { %555 = vmatprep.subr.bf16.mxu0 %v2580_v14  ;;  %2254 = vmatpush3.bf16.msra.mxu1 %v2633_v39  ;;  %v348_v7 = vcombine.high %v2694_v4, %v2695_v5  ;;  %v2697_v9 = vld.sshfl [vmem:[%s3171_s0 + $0x78] sm:$0xff pattern:$0x76325410]  ;;  %v347_v10 = vcombine.low %v2694_v4, %v2695_v5  ;;  %v2637_v14 = vld [vmem:[%s3173_s2 + $0x28] sm:$0xff]   ;;  %v2639_v16 = vld [vmem:[%s3173_s2 + $0x30] sm:$0xff]  }
  0x84   :  { %2255 = vmatprep.subr.bf16.mxu1 %v2634_v40  ;;  %v366_v11 = vcombine.high %v2696_v8, %v2697_v9  ;;  %v365_v13 = vcombine.low %v2696_v8, %v2697_v9 }
  0x86   :  { %556 = vmatpush1.bf16.msra.mxu0 %v2582_v15  ;;  %v2638_v15 = vld [vmem:[%s3173_s2 + $0x70] sm:$0xff]  }
  0x87   :  { %557 = vmatprep.subr.bf16.mxu0 %v2583_v18  ;;  %2256 = vmatpush3.bf16.msra.mxu1 %v2635_v43  ;;  %v2641_v18 = vld [vmem:[%s3173_s2 + $0x38] sm:$0xff]  }
  0x88   :  { %2257 = vmatprep.subr.bf16.mxu1 %v2636_v44 }
  0x8a   :  { %558 = vmatpush1.bf16.msra.mxu0 %v2585_v19  ;;  %v2642_v19 = vld [vmem:[#allocation4] sm:$0xff]  }
  0x8b   :  { %559 = vmatprep.subr.bf16.mxu0 %v2586_v21  ;;  %2258 = vmatpush3.bf16.msra.mxu1 %v2637_v14  ;;  %v179_v21 = vld [vmem:[%s3179_s8] ss:$8 sm:$0x3] }
  0x8c   :  { %2259 = vmatprep.subr.bf16.mxu1 %v2638_v15 }
  0x8e   :  { %560 = vmatpush1.bf16.msra.mxu0 %v2588_v22  ;;  %v187_v22 = vsub.s32 1, %v2985_v12 }
  0x8f   :  { %561 = vmatprep.subr.bf16.mxu0 %v2589_v23  ;;  %2260 = vmatpush3.bf16.msra.mxu1 %v2639_v16  ;;  %v3096_v23 = vrot.slane %v179_v21, %v183_v20 }
  0x90   :  { %2261 = vmatprep.subr.bf16.mxu1 %v2640_v17 }
  0x92   :  { %562 = vmatpush1.bf16.msra.mxu0 %v2591_v24  ;;  %v3098_v24 = vrot.slane %v179_v21, %v187_v22 }
  0x93   :  { %563 = vmatprep.subr.bf16.mxu0 %v2592_v25  ;;  %2262 = vmatpush3.bf16.msra.mxu1 %v2641_v18 }
  0x94   :  { %2391 = vmatprep.subr.bf16.mxu1 %v2642_v19 }
  0x96   :  { %564 = vmatpush1.bf16.msra.mxu0 %v2594_v26 }
  0x97   :  { %565 = vmatprep.subr.bf16.mxu0 %v2595_v27 }
  0x9a   :  { %566 = vmatpush1.bf16.msra.mxu0 %v2597_v33 }
  0x9b   :  { %567 = vmatprep.subr.bf16.mxu0 %v2598_v34 }
  0x9e   :  { %568 = vmatpush1.bf16.msra.mxu0 %v2600_v35 }
  0x9f   :  { %569 = vmatprep.subr.bf16.mxu0 %v2601_v38 }
  0xa2   :  { %570 = vmatpush1.bf16.msra.mxu0 %v2603_v41  ;;  %v2643_v41 = vld [vmem:[#allocation4 + $0x8] sm:$0xff]  }
  0xa3   :  { %571 = vmatprep.subr.bf16.mxu0 %v2604_v42 }
  0xa6   :  { %572 = vmatpush1.bf16.msra.mxu0 %v2606_v45 }
  0xa7   :  { %573 = vmatprep.subr.bf16.mxu0 %v2607_v48 }
  0xaa   :  { %574 = vmatpush1.bf16.msra.mxu0 %v2609_v49  ;;  %v2644_v49 = vld [vmem:[#allocation4 + $0x10] sm:$0xff]  }
  0xad   :  { %576 = vmatmul.mubr.bf16.vlgmr.msra.gmra.mrb[0].mxu0 %v239_v52 }
  0xae   :  { %585 = vmatprep.mubr.bf16.mxu0 %v258_v53 }
  0xb5   :  { %586 = vmatmul.mubr.bf16.gmra.mrb[4].mxu0 %v257_v56 }
  0xb6   :  { %595 = vmatprep.mubr.bf16.mxu0 %v276_v57 }
  0xbd   :  { %596 = vmatmul.mubr.bf16.gmra.mrb[8].mxu0 %v275_v58 }
  0xbe   :  { %605 = vmatprep.mubr.bf16.mxu0 %v294_v59 }
  0xc5   :  { %606 = vmatmul.mubr.bf16.gmra.mrb[12].mxu0 %v293_v62 }
  0xc6   :  { %615 = vmatprep.mubr.bf16.mxu0 %v312_v63 }
  0xcd   :  { %616 = vmatmul.mubr.bf16.gmra.mrb[16].mxu0 %v311_v2 }
  0xce   :  { %625 = vmatprep.mubr.bf16.mxu0 %v330_v3 }
  0xd5   :  { %626 = vmatmul.mubr.bf16.gmra.mrb[20].mxu0 %v329_v6 }
  0xd6   :  { %635 = vmatprep.mubr.bf16.mxu0 %v348_v7 }
  0xdd   :  { %636 = vmatmul.mubr.bf16.gmra.mrb[24].mxu0 %v347_v10 }
  0xde   :  { %645 = vmatprep.mubr.bf16.mxu0 %v366_v11 }
  0xe5   :  { %646 = vmatmul.mubr.bf16.gmra.mrb[28].mxu0 %v365_v13 }
 0x180   :  { %v577_v25 = vpop.f32.mrb[0].mxu0 }
 0x181   :  { %v578_v26 = vadd.f32 %v577_v25, %v3096_v23  ;;  %v579_v27 = vpop.f32.mrb[1].mxu0 }
 0x182   :  { %v580_v28 = vadd.f32 %v579_v27, %v3098_v24  ;;  %v581_v29 = vpop.f32.mrb[2].mxu0 }
 0x183   :  { %v582_v30 = vadd.f32 %v581_v29, %v3096_v23  ;;  %v583_v31 = vpop.f32.mrb[3].mxu0  ;;  %v656_v33 = vmax.f32 %v578_v26, 0.0 }
 0x184   :  { %v584_v32 = vadd.f32 %v583_v31, %v3098_v24  ;;  %v657_v35 = vmax.f32 %v580_v28, 0.0 }
 0x185   :  { %v658_v34 = vmax.f32 %v582_v30, 0.0 }
 0x186   :  { %v659_v12 = vmax.f32 %v584_v32, 0.0 }
 0x187   :  { %v688_v36 = vpack.c.bf16 %v658_v34, %v656_v33 }
 0x188   :  { %v587_v37 = vpop.f32.mrb[4].mxu0  ;;  %v689_v38 = vpack.c.bf16 %v659_v12, %v657_v35 }
 0x189   :  { %v588_v39 = vadd.f32 %v587_v37, %v3096_v23  ;;  %v589_v40 = vpop.f32.mrb[5].mxu0 }
 0x18a   :  { %v590_v42 = vadd.f32 %v589_v40, %v3098_v24  ;;  %v591_v43 = vpop.f32.mrb[6].mxu0  ;;  %865 = vmatprep.mubr.bf16.mxu1 %v689_v38 }
 0x18b   :  { %v592_v44 = vadd.f32 %v591_v43, %v3096_v23  ;;  %v593_v45 = vpop.f32.mrb[7].mxu0  ;;  %866 = vmatmul.mubr.bf16.vlgmr.msra.gmra.mrb[0].mxu1 %v688_v36  ;;  %v660_v47 = vmax.f32 %v588_v39, 0.0 }
 0x18c   :  { %v594_v46 = vadd.f32 %v593_v45, %v3098_v24  ;;  %2392 = vmatpush3.bf16.msra.mxu1 %v2642_v19  ;;  %v661_v50 = vmax.f32 %v590_v42, 0.0 }
 0x18d   :  { %v662_v48 = vmax.f32 %v592_v44, 0.0  ;;  %2393 = vmatprep.subr.bf16.mxu1 %v2643_v41 }
 0x18e   :  { %v663_v51 = vmax.f32 %v594_v46, 0.0 }
 0x18f   :  { %v690_v52 = vpack.c.bf16 %v662_v48, %v660_v47 }
 0x190   :  { %v691_v53 = vpack.c.bf16 %v663_v51, %v661_v50  ;;  %v597_v54 = vpop.f32.mrb[8].mxu0  ;;  %2394 = vmatpush3.bf16.msra.mxu1 %v2643_v41 }
 0x191   :  { %v598_v55 = vadd.f32 %v597_v54, %v3096_v23  ;;  %v599_v56 = vpop.f32.mrb[9].mxu0  ;;  %2395 = vmatprep.subr.bf16.mxu1 %v2644_v49 }
 0x192   :  { %v600_v57 = vadd.f32 %v599_v56, %v3098_v24  ;;  %v601_v58 = vpop.f32.mrb[10].mxu0  ;;  %873 = vmatprep.mubr.bf16.mxu1 %v691_v53 }
 0x193   :  { %v602_v59 = vadd.f32 %v601_v58, %v3096_v23  ;;  %v603_v60 = vpop.f32.mrb[11].mxu0  ;;  %874 = vmatmul.mubr.bf16.gmra.mrb[4].mxu1 %v690_v52  ;;  %v664_v62 = vmax.f32 %v598_v55, 0.0 }
 0x194   :  { %v604_v61 = vadd.f32 %v603_v60, %v3098_v24  ;;  %2396 = vmatpush3.bf16.msra.mxu1 %v2644_v49  ;;  %v665_v0 = vmax.f32 %v600_v57, 0.0 }
 0x195   :  { %v666_v63 = vmax.f32 %v602_v59, 0.0 }
 0x196   :  { %v667_v1 = vmax.f32 %v604_v61, 0.0 }
 0x197   :  { %v692_v2 = vpack.c.bf16 %v666_v63, %v664_v62 }
 0x198   :  { %v693_v3 = vpack.c.bf16 %v667_v1, %v665_v0  ;;  %v607_v4 = vpop.f32.mrb[12].mxu0 }
 0x199   :  { %v608_v5 = vadd.f32 %v607_v4, %v3096_v23  ;;  %v609_v6 = vpop.f32.mrb[13].mxu0 }
 0x19a   :  { %v610_v7 = vadd.f32 %v609_v6, %v3098_v24  ;;  %v611_v8 = vpop.f32.mrb[14].mxu0  ;;  %881 = vmatprep.mubr.bf16.mxu1 %v693_v3 }
 0x19b   :  { %v612_v9 = vadd.f32 %v611_v8, %v3096_v23  ;;  %v613_v10 = vpop.f32.mrb[15].mxu0  ;;  %882 = vmatmul.mubr.bf16.gmra.mrb[8].mxu1 %v692_v2  ;;  %v668_v13 = vmax.f32 %v608_v5, 0.0 }
 0x19c   :  { %v614_v11 = vadd.f32 %v613_v10, %v3098_v24  ;;  %v669_v15 = vmax.f32 %v610_v7, 0.0 }
 0x19d   :  { %v670_v14 = vmax.f32 %v612_v9, 0.0 }
 0x19e   :  { %v671_v16 = vmax.f32 %v614_v11, 0.0 }
 0x19f   :  { %v694_v17 = vpack.c.bf16 %v670_v14, %v668_v13  ;;  %v2645_v13 = vld [vmem:[#allocation4 + $0x18] sm:$0xff]   ;;  %v2646_v14 = vld [vmem:[#allocation4 + $0x20] sm:$0xff]  }
 0x1a0   :  { %v695_v18 = vpack.c.bf16 %v671_v16, %v669_v15  ;;  %v617_v19 = vpop.f32.mrb[16].mxu0  ;;  %2397 = vmatprep.subr.bf16.mxu1 %v2645_v13  ;;  %v2647_v15 = vld [vmem:[#allocation4 + $0x28] sm:$0xff]   ;;  %v2650_v16 = vld [vmem:[#allocation6] sm:$0xff]  }
 0x1a1   :  { %v618_v20 = vadd.f32 %v617_v19, %v3096_v23  ;;  %v619_v21 = vpop.f32.mrb[17].mxu0  ;;  %2398 = vmatpush3.bf16.msra.mxu1 %v2645_v13  ;;  %2423 = vmatprep.subr.bf16.mxu0 %v2650_v16  ;;  %v2653_v19 = vld [vmem:[#allocation6 + $0x18] sm:$0xff]  }
 0x1a2   :  { %v620_v22 = vadd.f32 %v619_v21, %v3098_v24  ;;  %v621_v25 = vpop.f32.mrb[18].mxu0  ;;  %889 = vmatprep.mubr.bf16.mxu1 %v695_v18  ;;  %2399 = vmatprep.subr.bf16.mxu1 %v2646_v14  ;;  %v2652_v18 = vld [vmem:[#allocation6 + $0x10] sm:$0xff]   ;;  %v2655_v21 = vld [vmem:[#allocation6 + $0x28] sm:$0xff]  }
 0x1a3   :  { %v622_v26 = vadd.f32 %v621_v25, %v3096_v23  ;;  %v623_v27 = vpop.f32.mrb[19].mxu0  ;;  %890 = vmatmul.mubr.bf16.gmra.mrb[12].mxu1 %v694_v17  ;;  %v672_v29 = vmax.f32 %v618_v20, 0.0  ;;  %v2651_v17 = vld [vmem:[#allocation6 + $0x8] sm:$0xff]   ;;  %2424 = vmatpush3.bf16.msra.mxu0 %v2650_v16  ;;  %v2654_v20 = vld [vmem:[#allocation6 + $0x20] sm:$0xff]  }
 0x1a4   :  { %v624_v28 = vadd.f32 %v623_v27, %v3098_v24  ;;  %v673_v31 = vmax.f32 %v620_v22, 0.0  ;;  %2425 = vmatprep.subr.bf16.mxu0 %v2651_v17  ;;  %v3135_v25 = vld [vmem:[%s3179_s8 + $0x1] ss:$0 sm:$0xff] }
 0x1a5   :  { %v674_v30 = vmax.f32 %v622_v26, 0.0  ;;  %2400 = vmatpush3.bf16.msra.mxu1 %v2646_v14 }
 0x1a6   :  { %v675_v32 = vmax.f32 %v624_v28, 0.0  ;;  %2401 = vmatprep.subr.bf16.mxu1 %v2647_v15 }
 0x1a7   :  { %v696_v33 = vpack.c.bf16 %v674_v30, %v672_v29  ;;  %2426 = vmatpush3.bf16.msra.mxu0 %v2651_v17 }
 0x1a8   :  { %v697_v34 = vpack.c.bf16 %v675_v32, %v673_v31  ;;  %v627_v35 = vpop.f32.mrb[20].mxu0  ;;  %2427 = vmatprep.subr.bf16.mxu0 %v2652_v18 }
 0x1a9   :  { %v628_v12 = vadd.f32 %v627_v35, %v3096_v23  ;;  %v629_v36 = vpop.f32.mrb[21].mxu0  ;;  %2402 = vmatpush3.bf16.msra.mxu1 %v2647_v15 }
 0x1aa   :  { %v630_v37 = vadd.f32 %v629_v36, %v3098_v24  ;;  %v631_v38 = vpop.f32.mrb[22].mxu0  ;;  %897 = vmatprep.mubr.bf16.mxu1 %v697_v34 }
 0x1ab   :  { %v632_v39 = vadd.f32 %v631_v38, %v3096_v23  ;;  %v633_v40 = vpop.f32.mrb[23].mxu0  ;;  %898 = vmatmul.mubr.bf16.gmra.mrb[16].mxu1 %v696_v33  ;;  %v676_v42 = vmax.f32 %v628_v12, 0.0  ;;  %2428 = vmatpush3.bf16.msra.mxu0 %v2652_v18 }
 0x1ac   :  { %v634_v41 = vadd.f32 %v633_v40, %v3098_v24  ;;  %v677_v44 = vmax.f32 %v630_v37, 0.0  ;;  %2429 = vmatprep.subr.bf16.mxu0 %v2653_v19 }
 0x1ad   :  { %v678_v43 = vmax.f32 %v632_v39, 0.0 }
 0x1ae   :  { %v679_v45 = vmax.f32 %v634_v41, 0.0 }
 0x1af   :  { %v698_v46 = vpack.c.bf16 %v678_v43, %v676_v42  ;;  %2430 = vmatpush3.bf16.msra.mxu0 %v2653_v19 }
 0x1b0   :  { %v699_v47 = vpack.c.bf16 %v679_v45, %v677_v44  ;;  %v637_v48 = vpop.f32.mrb[24].mxu0  ;;  %2431 = vmatprep.subr.bf16.mxu0 %v2654_v20 }
 0x1b1   :  { %v638_v49 = vadd.f32 %v637_v48, %v3096_v23  ;;  %v639_v50 = vpop.f32.mrb[25].mxu0 }
 0x1b2   :  { %v640_v51 = vadd.f32 %v639_v50, %v3098_v24  ;;  %v641_v52 = vpop.f32.mrb[26].mxu0  ;;  %905 = vmatprep.mubr.bf16.mxu1 %v699_v47 }
 0x1b3   :  { %v642_v53 = vadd.f32 %v641_v52, %v3096_v23  ;;  %v643_v54 = vpop.f32.mrb[27].mxu0  ;;  %906 = vmatmul.mubr.bf16.gmra.mrb[20].mxu1 %v698_v46  ;;  %v680_v56 = vmax.f32 %v638_v49, 0.0  ;;  %2432 = vmatpush3.bf16.msra.mxu0 %v2654_v20 }
 0x1b4   :  { %v644_v55 = vadd.f32 %v643_v54, %v3098_v24  ;;  %v681_v58 = vmax.f32 %v640_v51, 0.0  ;;  %2433 = vmatprep.subr.bf16.mxu0 %v2655_v21 }
 0x1b5   :  { %v682_v57 = vmax.f32 %v642_v53, 0.0 }
 0x1b6   :  { %v683_v59 = vmax.f32 %v644_v55, 0.0 }
 0x1b7   :  { %v700_v60 = vpack.c.bf16 %v682_v57, %v680_v56  ;;  %2434 = vmatpush3.bf16.msra.mxu0 %v2655_v21 }
 0x1b8   :  { %v701_v61 = vpack.c.bf16 %v683_v59, %v681_v58  ;;  %v647_v62 = vpop.f32.mrb[28].mxu0 }
 0x1b9   :  { %v648_v63 = vadd.f32 %v647_v62, %v3096_v23  ;;  %v649_v0 = vpop.f32.mrb[29].mxu0 }
 0x1ba   :  { %v650_v1 = vadd.f32 %v649_v0, %v3098_v24  ;;  %v651_v2 = vpop.f32.mrb[30].mxu0  ;;  %913 = vmatprep.mubr.bf16.mxu1 %v701_v61 }
 0x1bb   :  { %v652_v3 = vadd.f32 %v651_v2, %v3096_v23  ;;  %v653_v4 = vpop.f32.mrb[31].mxu0  ;;  %914 = vmatmul.mubr.bf16.gmra.mrb[24].mxu1 %v700_v60  ;;  %v684_v6 = vmax.f32 %v648_v63, 0.0  ;;  %v2648_v23 = vld [vmem:[#allocation4 + $0x30] sm:$0xff]  }
 0x1bc   :  { %v654_v5 = vadd.f32 %v653_v4, %v3098_v24  ;;  %v685_v8 = vmax.f32 %v650_v1, 0.0  ;;  %2403 = vmatprep.subr.bf16.mxu1 %v2648_v23  ;;  %v2649_v24 = vld [vmem:[#allocation4 + $0x38] sm:$0xff]  }
 0x1bd   :  { %v686_v7 = vmax.f32 %v652_v3, 0.0  ;;  %2404 = vmatpush3.bf16.msra.mxu1 %v2648_v23 }
 0x1be   :  { %v687_v9 = vmax.f32 %v654_v5, 0.0  ;;  %2405 = vmatprep.subr.bf16.mxu1 %v2649_v24 }
 0x1bf   :  { %v702_v10 = vpack.c.bf16 %v686_v7, %v684_v6 }
 0x1c0   :  { %v703_v11 = vpack.c.bf16 %v687_v9, %v685_v8 }
 0x1c1   :  { %2406 = vmatpush3.bf16.msra.mxu1 %v2649_v24 }
 0x1c2   :  { %921 = vmatprep.mubr.bf16.mxu1 %v703_v11 }
 0x1c3   :  { %922 = vmatmul.mubr.bf16.gmra.mrb[28].mxu1 %v702_v10 }
 0x25e   :  { %v2263_v22 = vpop.f32.mrb[0].mxu1 }
 0x25f   :  { %v2264_v26 = vpop.f32.mrb[1].mxu1 }
 0x260   :  { %v2265_v27 = vadd.f32 %v2264_v26, %v2263_v22  ;;  %v2266_v28 = vpop.f32.mrb[2].mxu1 }
 0x261   :  { %v2267_v29 = vpop.f32.mrb[3].mxu1 }
 0x262   :  { %v868_v30 = vadd.f32 %v2265_v27, %v3135_v25  ;;  %v2268_v31 = vadd.f32 %v2267_v29, %v2266_v28 }
 0x264   :  { %v871_v32 = vadd.f32 %v2268_v31, %v3135_v25  ;;  %v930_v33 = vmax.f32 %v868_v30, 0.0 }
 0x266   :  { %v931_v34 = vmax.f32 %v871_v32, 0.0  ;;  %v2269_v35 = vpop.f32.mrb[4].mxu1 }
 0x267   :  { %v2270_v12 = vpop.f32.mrb[5].mxu1 }
 0x268   :  { %v2271_v36 = vadd.f32 %v2270_v12, %v2269_v35  ;;  %v2272_v37 = vpop.f32.mrb[6].mxu1  ;;  %v946_v38 = vpack.c.bf16 %v931_v34, %v930_v33 }
 0x269   :  { %v2273_v39 = vpop.f32.mrb[7].mxu1 }
 0x26a   :  { %v876_v40 = vadd.f32 %v2271_v36, %v3135_v25  ;;  %v2274_v41 = vadd.f32 %v2273_v39, %v2272_v37  ;;  %2407 = vmatprep.mubr.bf16.mxu1 %v946_v38 }
 0x26c   :  { %v879_v42 = vadd.f32 %v2274_v41, %v3135_v25  ;;  %v932_v43 = vmax.f32 %v876_v40, 0.0 }
 0x26e   :  { %v933_v44 = vmax.f32 %v879_v42, 0.0  ;;  %v2275_v45 = vpop.f32.mrb[8].mxu1 }
 0x26f   :  { %v2276_v46 = vpop.f32.mrb[9].mxu1 }
 0x270   :  { %v947_v47 = vpack.c.bf16 %v933_v44, %v932_v43  ;;  %v2277_v48 = vadd.f32 %v2276_v46, %v2275_v45  ;;  %v2278_v49 = vpop.f32.mrb[10].mxu1 }
 0x271   :  { %v2279_v50 = vpop.f32.mrb[11].mxu1 }
 0x272   :  { %v884_v51 = vadd.f32 %v2277_v48, %v3135_v25  ;;  %v2280_v52 = vadd.f32 %v2279_v50, %v2278_v49  ;;  %2408 = vmatmul.mubr.bf16.vlgmr.msra.gmra.mrb[32].mxu1 %v947_v47  ;;  %v2656_v49 = vld [vmem:[#allocation6 + $0x30] sm:$0xff]   ;;  %v2657_v50 = vld [vmem:[#allocation6 + $0x38] sm:$0xff]  }
 0x273   :  { %2435 = vmatprep.subr.bf16.mxu0 %v2656_v49 }
 0x274   :  { %v887_v53 = vadd.f32 %v2280_v52, %v3135_v25  ;;  %v934_v54 = vmax.f32 %v884_v51, 0.0  ;;  %2436 = vmatpush3.bf16.msra.mxu0 %v2656_v49  ;;  %v2658_v51 = vld [vmem:[#allocation7] sm:$0xff]   ;;  %v2659_v52 = vld [vmem:[#allocation7 + $0x8] sm:$0xff]  }
 0x275   :  { %2437 = vmatprep.subr.bf16.mxu0 %v2657_v50  ;;  %2455 = vmatprep.subr.bf16.mxu1 %v2658_v51 }
 0x276   :  { %v935_v55 = vmax.f32 %v887_v53, 0.0  ;;  %v2281_v56 = vpop.f32.mrb[12].mxu1  ;;  %2456 = vmatpush3.bf16.msra.mxu1 %v2658_v51  ;;  %v2660_v53 = vld [vmem:[#allocation7 + $0x10] sm:$0xff]   ;;  %v2665_v51 = vld [vmem:[#allocation7 + $0x38] sm:$0xff]  }
 0x277   :  { %v2282_v57 = vpop.f32.mrb[13].mxu1  ;;  %2457 = vmatprep.subr.bf16.mxu1 %v2659_v52 }
 0x278   :  { %v2283_v58 = vadd.f32 %v2282_v57, %v2281_v56  ;;  %v2284_v59 = vpop.f32.mrb[14].mxu1  ;;  %v948_v60 = vpack.c.bf16 %v935_v55, %v934_v54  ;;  %2438 = vmatpush3.bf16.msra.mxu0 %v2657_v50  ;;  %v2661_v54 = vld [vmem:[#allocation7 + $0x18] sm:$0xff]   ;;  %v2663_v55 = vld [vmem:[#allocation7 + $0x28] sm:$0xff]   ;;  %v970_v56 = vld [vmem:[%s3179_s8 + $0x2] ss:$0 sm:$0xff] }
 0x279   :  { %v2285_v61 = vpop.f32.mrb[15].mxu1  ;;  %v2664_v50 = vld [vmem:[#allocation7 + $0x30] sm:$0xff]  }
 0x27a   :  { %v892_v62 = vadd.f32 %v2283_v58, %v3135_v25  ;;  %v2286_v63 = vadd.f32 %v2285_v61, %v2284_v59  ;;  %2411 = vmatprep.mubr.bf16.mxu1 %v948_v60  ;;  %2458 = vmatpush3.bf16.msra.mxu1 %v2659_v52  ;;  %v2666_v52 = vld [vmem:[#allocation9] sm:$0xff]  }
 0x27b   :  { %2459 = vmatprep.subr.bf16.mxu1 %v2660_v53  ;;  %2487 = vmatprep.subr.bf16.mxu0 %v2666_v52 }
 0x27c   :  { %v895_v0 = vadd.f32 %v2286_v63, %v3135_v25  ;;  %v936_v1 = vmax.f32 %v892_v62, 0.0 }
 0x27e   :  { %v937_v2 = vmax.f32 %v895_v0, 0.0  ;;  %v2287_v3 = vpop.f32.mrb[16].mxu1  ;;  %2460 = vmatpush3.bf16.msra.mxu1 %v2660_v53  ;;  %v2667_v53 = vld [vmem:[#allocation9 + $0x8] sm:$0xff]  }
 0x27f   :  { %v2288_v4 = vpop.f32.mrb[17].mxu1  ;;  %2461 = vmatprep.subr.bf16.mxu1 %v2661_v54 }
 0x280   :  { %v2289_v5 = vadd.f32 %v2288_v4, %v2287_v3  ;;  %v2290_v6 = vpop.f32.mrb[18].mxu1  ;;  %v949_v7 = vpack.c.bf16 %v937_v2, %v936_v1 }
 0x281   :  { %v2291_v8 = vpop.f32.mrb[19].mxu1 }
 0x282   :  { %v900_v9 = vadd.f32 %v2289_v5, %v3135_v25  ;;  %v2292_v10 = vadd.f32 %v2291_v8, %v2290_v6  ;;  %2412 = vmatmul.mubr.bf16.gmra.mrb[36].mxu1 %v949_v7 }
 0x283   :  { %2462 = vmatpush3.bf16.msra.mxu1 %v2661_v54  ;;  %v2668_v54 = vld [vmem:[#allocation9 + $0x10] sm:$0xff]  }
 0x284   :  { %v903_v11 = vadd.f32 %v2292_v10, %v3135_v25  ;;  %v938_v13 = vmax.f32 %v900_v9, 0.0 }
 0x286   :  { %v939_v14 = vmax.f32 %v903_v11, 0.0  ;;  %v2293_v15 = vpop.f32.mrb[20].mxu1 }
 0x287   :  { %v2294_v23 = vpop.f32.mrb[21].mxu1 }
 0x288   :  { %v2295_v24 = vadd.f32 %v2294_v23, %v2293_v15  ;;  %v2296_v16 = vpop.f32.mrb[22].mxu1  ;;  %v950_v17 = vpack.c.bf16 %v939_v14, %v938_v13 }
 0x289   :  { %v2297_v18 = vpop.f32.mrb[23].mxu1 }
 0x28a   :  { %v908_v19 = vadd.f32 %v2295_v24, %v3135_v25  ;;  %v2298_v20 = vadd.f32 %v2297_v18, %v2296_v16  ;;  %2415 = vmatprep.mubr.bf16.mxu1 %v950_v17 }
 0x28c   :  { %v911_v21 = vadd.f32 %v2298_v20, %v3135_v25  ;;  %v940_v22 = vmax.f32 %v908_v19, 0.0 }
 0x28e   :  { %v941_v26 = vmax.f32 %v911_v21, 0.0  ;;  %v2299_v27 = vpop.f32.mrb[24].mxu1 }
 0x28f   :  { %v2300_v28 = vpop.f32.mrb[25].mxu1 }
 0x290   :  { %v2301_v29 = vadd.f32 %v2300_v28, %v2299_v27  ;;  %v2302_v30 = vpop.f32.mrb[26].mxu1  ;;  %v951_v31 = vpack.c.bf16 %v941_v26, %v940_v22 }
 0x291   :  { %v2303_v32 = vpop.f32.mrb[27].mxu1 }
 0x292   :  { %v916_v33 = vadd.f32 %v2301_v29, %v3135_v25  ;;  %v2304_v34 = vadd.f32 %v2303_v32, %v2302_v30  ;;  %2416 = vmatmul.mubr.bf16.gmra.mrb[40].mxu1 %v951_v31 }
 0x294   :  { %v919_v35 = vadd.f32 %v2304_v34, %v3135_v25  ;;  %v942_v12 = vmax.f32 %v916_v33, 0.0 }
 0x296   :  { %v943_v36 = vmax.f32 %v919_v35, 0.0  ;;  %v2305_v37 = vpop.f32.mrb[28].mxu1 }
 0x297   :  { %v2306_v38 = vpop.f32.mrb[29].mxu1 }
 0x298   :  { %v2307_v39 = vadd.f32 %v2306_v38, %v2305_v37  ;;  %v2308_v40 = vpop.f32.mrb[30].mxu1  ;;  %v952_v41 = vpack.c.bf16 %v943_v36, %v942_v12 }
 0x299   :  { %v2309_v42 = vpop.f32.mrb[31].mxu1 }
 0x29a   :  { %v924_v43 = vadd.f32 %v2307_v39, %v3135_v25  ;;  %v2310_v44 = vadd.f32 %v2309_v42, %v2308_v40  ;;  %2419 = vmatprep.mubr.bf16.mxu1 %v952_v41 }
 0x29c   :  { %v927_v45 = vadd.f32 %v2310_v44, %v3135_v25  ;;  %v944_v46 = vmax.f32 %v924_v43, 0.0  ;;  %v2662_v25 = vld [vmem:[#allocation7 + $0x20] sm:$0xff]  }
 0x29d   :  { %2463 = vmatprep.subr.bf16.mxu1 %v2662_v25 }
 0x29e   :  { %v945_v47 = vmax.f32 %v927_v45, 0.0  ;;  %2464 = vmatpush3.bf16.msra.mxu1 %v2662_v25  ;;  %v2669_v25 = vld [vmem:[#allocation9 + $0x18] sm:$0xff]  }
 0x29f   :  { %2465 = vmatprep.subr.bf16.mxu1 %v2663_v55 }
 0x2a0   :  { %v953_v48 = vpack.c.bf16 %v945_v47, %v944_v46 }
 0x2a2   :  { %2420 = vmatmul.mubr.bf16.gmra.mrb[44].mxu1 %v953_v48 }
 0x2a3   :  { %2466 = vmatpush3.bf16.msra.mxu1 %v2663_v55  ;;  %v2670_v55 = vld [vmem:[#allocation9 + $0x20] sm:$0xff]  }
 0x2a4   :  { %2467 = vmatprep.subr.bf16.mxu1 %v2664_v50 }
 0x2a7   :  { %2468 = vmatpush3.bf16.msra.mxu1 %v2664_v50 }
 0x2a8   :  { %2469 = vmatprep.subr.bf16.mxu1 %v2665_v51 }
 0x2ab   :  { %2470 = vmatpush3.bf16.msra.mxu1 %v2665_v51  ;;  %v2672_v51 = vld [vmem:[#allocation9 + $0x30] sm:$0xff]  }
 0x345   :  { %v2409_v57 = vpop.f32.mrb[32].mxu1 }
 0x346   :  { %v1062_v58 = vadd.f32 %v2409_v57, %v970_v56  ;;  %v1053_v59 = vpop.f32.mrb[33].mxu1  ;;  %v1156_v57 = vld [vmem:[%s3179_s8 + $0x3] ss:$0 sm:$0xff] }
 0x347   :  { %v1054_v60 = vadd.f32 %v1053_v59, %v970_v56  ;;  %v2410_v61 = vpop.f32.mrb[34].mxu1 }
 0x348   :  { %v1065_v62 = vadd.f32 %v2410_v61, %v970_v56  ;;  %v1056_v63 = vpop.f32.mrb[35].mxu1  ;;  %v1118_v1 = vmax.f32 %v1062_v58, 0.0 }
 0x349   :  { %v1057_v0 = vadd.f32 %v1056_v63, %v970_v56  ;;  %v1116_v3 = vmax.f32 %v1054_v60, 0.0 }
 0x34a   :  { %v1119_v2 = vmax.f32 %v1065_v62, 0.0 }
 0x34b   :  { %v1117_v4 = vmax.f32 %v1057_v0, 0.0 }
 0x34c   :  { %v1133_v5 = vpack.c.bf16 %v1119_v2, %v1118_v1 }
 0x34d   :  { %v1132_v6 = vpack.c.bf16 %v1117_v4, %v1116_v3 }
 0x34f   :  { %2439 = vmatprep.mubr.bf16.mxu0 %v1132_v6 }
 0x350   :  { %2440 = vmatmul.mubr.bf16.vlgmr.msra.gmra.mrb[32].mxu0 %v1133_v5 }
 0x351   :  { %2488 = vmatpush3.bf16.msra.mxu0 %v2666_v52  ;;  %v2673_v52 = vld [vmem:[#allocation9 + $0x38] sm:$0xff]  }
 0x352   :  { %2489 = vmatprep.subr.bf16.mxu0 %v2667_v53 }
 0x355   :  { %v2413_v7 = vpop.f32.mrb[36].mxu1  ;;  %2490 = vmatpush3.bf16.msra.mxu0 %v2667_v53  ;;  %v2674_v53 = vld [vmem:[#allocation10] sm:$0xff]  }
 0x356   :  { %v1078_v8 = vadd.f32 %v2413_v7, %v970_v56  ;;  %v1069_v9 = vpop.f32.mrb[37].mxu1  ;;  %2491 = vmatprep.subr.bf16.mxu0 %v2668_v54  ;;  %2519 = vmatprep.subr.bf16.mxu1 %v2674_v53 }
 0x357   :  { %v1070_v10 = vadd.f32 %v1069_v9, %v970_v56  ;;  %v2414_v11 = vpop.f32.mrb[38].mxu1 }
 0x358   :  { %v1081_v13 = vadd.f32 %v2414_v11, %v970_v56  ;;  %v1072_v14 = vpop.f32.mrb[39].mxu1  ;;  %v1122_v23 = vmax.f32 %v1078_v8, 0.0 }
 0x359   :  { %v1073_v15 = vadd.f32 %v1072_v14, %v970_v56  ;;  %v1120_v16 = vmax.f32 %v1070_v10, 0.0  ;;  %2492 = vmatpush3.bf16.msra.mxu0 %v2668_v54  ;;  %v2675_v54 = vld [vmem:[#allocation10 + $0x8] sm:$0xff]  }
 0x35a   :  { %v1123_v24 = vmax.f32 %v1081_v13, 0.0  ;;  %2493 = vmatprep.subr.bf16.mxu0 %v2669_v25 }
 0x35b   :  { %v1121_v17 = vmax.f32 %v1073_v15, 0.0 }
 0x35c   :  { %v1135_v18 = vpack.c.bf16 %v1123_v24, %v1122_v23 }
 0x35d   :  { %v1134_v19 = vpack.c.bf16 %v1121_v17, %v1120_v16  ;;  %2494 = vmatpush3.bf16.msra.mxu0 %v2669_v25  ;;  %v2676_v25 = vld [vmem:[#allocation10 + $0x10] sm:$0xff]  }
 0x35e   :  { %2495 = vmatprep.subr.bf16.mxu0 %v2670_v55 }
 0x35f   :  { %2443 = vmatprep.mubr.bf16.mxu0 %v1134_v19 }
 0x360   :  { %2444 = vmatmul.mubr.bf16.gmra.mrb[36].mxu0 %v1135_v18 }
 0x361   :  { %2496 = vmatpush3.bf16.msra.mxu0 %v2670_v55  ;;  %v2677_v55 = vld [vmem:[#allocation10 + $0x18] sm:$0xff]  }
 0x365   :  { %v2417_v20 = vpop.f32.mrb[40].mxu1 }
 0x366   :  { %v1094_v21 = vadd.f32 %v2417_v20, %v970_v56  ;;  %v1085_v22 = vpop.f32.mrb[41].mxu1 }
 0x367   :  { %v1086_v26 = vadd.f32 %v1085_v22, %v970_v56  ;;  %v2418_v27 = vpop.f32.mrb[42].mxu1 }
 0x368   :  { %v1097_v28 = vadd.f32 %v2418_v27, %v970_v56  ;;  %v1088_v29 = vpop.f32.mrb[43].mxu1  ;;  %v1126_v31 = vmax.f32 %v1094_v21, 0.0 }
 0x369   :  { %v1089_v30 = vadd.f32 %v1088_v29, %v970_v56  ;;  %v1124_v33 = vmax.f32 %v1086_v26, 0.0 }
 0x36a   :  { %v1127_v32 = vmax.f32 %v1097_v28, 0.0 }
 0x36b   :  { %v1125_v34 = vmax.f32 %v1089_v30, 0.0 }
 0x36c   :  { %v1137_v35 = vpack.c.bf16 %v1127_v32, %v1126_v31 }
 0x36d   :  { %v1136_v12 = vpack.c.bf16 %v1125_v34, %v1124_v33 }
 0x36f   :  { %2447 = vmatprep.mubr.bf16.mxu0 %v1136_v12 }
 0x370   :  { %2448 = vmatmul.mubr.bf16.gmra.mrb[40].mxu0 %v1137_v35 }
 0x375   :  { %v2421_v36 = vpop.f32.mrb[44].mxu1 }
 0x376   :  { %v1110_v37 = vadd.f32 %v2421_v36, %v970_v56  ;;  %v1101_v38 = vpop.f32.mrb[45].mxu1 }
 0x377   :  { %v1102_v39 = vadd.f32 %v1101_v38, %v970_v56  ;;  %v2422_v40 = vpop.f32.mrb[46].mxu1 }
 0x378   :  { %v1113_v41 = vadd.f32 %v2422_v40, %v970_v56  ;;  %v1104_v42 = vpop.f32.mrb[47].mxu1  ;;  %v1130_v44 = vmax.f32 %v1110_v37, 0.0 }
 0x379   :  { %v1105_v43 = vadd.f32 %v1104_v42, %v970_v56  ;;  %v1128_v46 = vmax.f32 %v1102_v39, 0.0  ;;  %v2671_v56 = vld [vmem:[#allocation9 + $0x28] sm:$0xff]  }
 0x37a   :  { %v1131_v45 = vmax.f32 %v1113_v41, 0.0  ;;  %2497 = vmatprep.subr.bf16.mxu0 %v2671_v56 }
 0x37b   :  { %v1129_v47 = vmax.f32 %v1105_v43, 0.0  ;;  %2498 = vmatpush3.bf16.msra.mxu0 %v2671_v56  ;;  %v2678_v56 = vld [vmem:[#allocation10 + $0x20] sm:$0xff]  }
 0x37c   :  { %v1139_v48 = vpack.c.bf16 %v1131_v45, %v1130_v44  ;;  %2499 = vmatprep.subr.bf16.mxu0 %v2672_v51 }
 0x37d   :  { %v1138_v49 = vpack.c.bf16 %v1129_v47, %v1128_v46 }
 0x37f   :  { %2451 = vmatprep.mubr.bf16.mxu0 %v1138_v49  ;;  %2500 = vmatpush3.bf16.msra.mxu0 %v2672_v51 }
 0x380   :  { %2452 = vmatmul.mubr.bf16.gmra.mrb[44].mxu0 %v1139_v48  ;;  %2501 = vmatprep.subr.bf16.mxu0 %v2673_v52 }
 0x383   :  { %2502 = vmatpush3.bf16.msra.mxu0 %v2673_v52  ;;  %v2680_v52 = vld [vmem:[#allocation10 + $0x30] sm:$0xff]  }
 0x423   :  { %v2441_v58 = vpop.f32.mrb[32].mxu0 }
 0x424   :  { %v1248_v59 = vadd.f32 %v2441_v58, %v1156_v57  ;;  %v1239_v60 = vpop.f32.mrb[33].mxu0  ;;  %v1342_v58 = vld [vmem:[%s3179_s8 + $0x4] ss:$0 sm:$0xff] }
 0x425   :  { %v1240_v61 = vadd.f32 %v1239_v60, %v1156_v57  ;;  %v2442_v62 = vpop.f32.mrb[34].mxu0 }
 0x426   :  { %v1251_v63 = vadd.f32 %v2442_v62, %v1156_v57  ;;  %v1242_v0 = vpop.f32.mrb[35].mxu0  ;;  %v1304_v2 = vmax.f32 %v1248_v59, 0.0 }
 0x427   :  { %v1243_v1 = vadd.f32 %v1242_v0, %v1156_v57  ;;  %v1302_v4 = vmax.f32 %v1240_v61, 0.0 }
 0x428   :  { %v1305_v3 = vmax.f32 %v1251_v63, 0.0 }
 0x429   :  { %v1303_v5 = vmax.f32 %v1243_v1, 0.0 }
 0x42a   :  { %v1319_v6 = vpack.c.bf16 %v1305_v3, %v1304_v2 }
 0x42b   :  { %v1318_v7 = vpack.c.bf16 %v1303_v5, %v1302_v4 }
 0x42d   :  { %2471 = vmatprep.mubr.bf16.mxu1 %v1318_v7 }
 0x42e   :  { %2472 = vmatmul.mubr.bf16.vlgmr.msra.gmra.mrb[48].mxu1 %v1319_v6 }
 0x42f   :  { %2520 = vmatpush3.bf16.msra.mxu1 %v2674_v53  ;;  %v2681_v53 = vld [vmem:[#allocation10 + $0x38] sm:$0xff]  }
 0x430   :  { %2521 = vmatprep.subr.bf16.mxu1 %v2675_v54 }
 0x433   :  { %v2445_v8 = vpop.f32.mrb[36].mxu0  ;;  %2522 = vmatpush3.bf16.msra.mxu1 %v2675_v54  ;;  %v1528_v54 = vld [vmem:[%s3179_s8 + $0x5] ss:$0 sm:$0xff] }
 0x434   :  { %v1264_v9 = vadd.f32 %v2445_v8, %v1156_v57  ;;  %v1255_v10 = vpop.f32.mrb[37].mxu0  ;;  %2523 = vmatprep.subr.bf16.mxu1 %v2676_v25 }
 0x435   :  { %v1256_v11 = vadd.f32 %v1255_v10, %v1156_v57  ;;  %v2446_v13 = vpop.f32.mrb[38].mxu0 }
 0x436   :  { %v1267_v14 = vadd.f32 %v2446_v13, %v1156_v57  ;;  %v1258_v15 = vpop.f32.mrb[39].mxu0  ;;  %v1308_v24 = vmax.f32 %v1264_v9, 0.0 }
 0x437   :  { %v1259_v23 = vadd.f32 %v1258_v15, %v1156_v57  ;;  %v1306_v17 = vmax.f32 %v1256_v11, 0.0  ;;  %2524 = vmatpush3.bf16.msra.mxu1 %v2676_v25 }
 0x438   :  { %v1309_v16 = vmax.f32 %v1267_v14, 0.0  ;;  %2525 = vmatprep.subr.bf16.mxu1 %v2677_v55 }
 0x439   :  { %v1307_v18 = vmax.f32 %v1259_v23, 0.0 }
 0x43a   :  { %v1321_v19 = vpack.c.bf16 %v1309_v16, %v1308_v24 }
 0x43b   :  { %v1320_v20 = vpack.c.bf16 %v1307_v18, %v1306_v17  ;;  %2526 = vmatpush3.bf16.msra.mxu1 %v2677_v55 }
 0x43c   :  { %2527 = vmatprep.subr.bf16.mxu1 %v2678_v56 }
 0x43d   :  { %2475 = vmatprep.mubr.bf16.mxu1 %v1320_v20 }
 0x43e   :  { %2476 = vmatmul.mubr.bf16.gmra.mrb[52].mxu1 %v1321_v19 }
 0x43f   :  { %2528 = vmatpush3.bf16.msra.mxu1 %v2678_v56 }
 0x443   :  { %v2449_v21 = vpop.f32.mrb[40].mxu0 }
 0x444   :  { %v1280_v22 = vadd.f32 %v2449_v21, %v1156_v57  ;;  %v1271_v26 = vpop.f32.mrb[41].mxu0 }
 0x445   :  { %v1272_v27 = vadd.f32 %v1271_v26, %v1156_v57  ;;  %v2450_v28 = vpop.f32.mrb[42].mxu0 }
 0x446   :  { %v1283_v29 = vadd.f32 %v2450_v28, %v1156_v57  ;;  %v1274_v30 = vpop.f32.mrb[43].mxu0  ;;  %v1312_v32 = vmax.f32 %v1280_v22, 0.0 }
 0x447   :  { %v1275_v31 = vadd.f32 %v1274_v30, %v1156_v57  ;;  %v1310_v34 = vmax.f32 %v1272_v27, 0.0 }
 0x448   :  { %v1313_v33 = vmax.f32 %v1283_v29, 0.0 }
 0x449   :  { %v1311_v35 = vmax.f32 %v1275_v31, 0.0 }
 0x44a   :  { %v1323_v12 = vpack.c.bf16 %v1313_v33, %v1312_v32 }
 0x44b   :  { %v1322_v36 = vpack.c.bf16 %v1311_v35, %v1310_v34 }
 0x44d   :  { %2479 = vmatprep.mubr.bf16.mxu1 %v1322_v36 }
 0x44e   :  { %2480 = vmatmul.mubr.bf16.gmra.mrb[56].mxu1 %v1323_v12 }
 0x453   :  { %v2453_v37 = vpop.f32.mrb[44].mxu0 }
 0x454   :  { %v1296_v38 = vadd.f32 %v2453_v37, %v1156_v57  ;;  %v1287_v39 = vpop.f32.mrb[45].mxu0 }
 0x455   :  { %v1288_v40 = vadd.f32 %v1287_v39, %v1156_v57  ;;  %v2454_v41 = vpop.f32.mrb[46].mxu0 }
 0x456   :  { %v1299_v42 = vadd.f32 %v2454_v41, %v1156_v57  ;;  %v1290_v43 = vpop.f32.mrb[47].mxu0  ;;  %v1316_v45 = vmax.f32 %v1296_v38, 0.0 }
 0x457   :  { %v1291_v44 = vadd.f32 %v1290_v43, %v1156_v57  ;;  %v1314_v47 = vmax.f32 %v1288_v40, 0.0  ;;  %v2679_v57 = vld [vmem:[#allocation10 + $0x28] sm:$0xff]  }
 0x458   :  { %v1317_v46 = vmax.f32 %v1299_v42, 0.0  ;;  %2529 = vmatprep.subr.bf16.mxu1 %v2679_v57 }
 0x459   :  { %v1315_v48 = vmax.f32 %v1291_v44, 0.0  ;;  %2530 = vmatpush3.bf16.msra.mxu1 %v2679_v57 }
 0x45a   :  { %v1325_v49 = vpack.c.bf16 %v1317_v46, %v1316_v45  ;;  %2531 = vmatprep.subr.bf16.mxu1 %v2680_v52 }
 0x45b   :  { %v1324_v50 = vpack.c.bf16 %v1315_v48, %v1314_v47 }
 0x45d   :  { %2483 = vmatprep.mubr.bf16.mxu1 %v1324_v50  ;;  %2532 = vmatpush3.bf16.msra.mxu1 %v2680_v52 }
 0x45e   :  { %2484 = vmatmul.mubr.bf16.gmra.mrb[60].mxu1 %v1325_v49  ;;  %2533 = vmatprep.subr.bf16.mxu1 %v2681_v53 }
 0x461   :  { %2534 = vmatpush3.bf16.msra.mxu1 %v2681_v53 }
 0x501   :  { %v2473_v59 = vpop.f32.mrb[48].mxu1 }
 0x502   :  { %v1434_v60 = vadd.f32 %v2473_v59, %v1342_v58  ;;  %v1425_v61 = vpop.f32.mrb[49].mxu1 }
 0x503   :  { %v1426_v62 = vadd.f32 %v1425_v61, %v1342_v58  ;;  %v2474_v63 = vpop.f32.mrb[50].mxu1 }
 0x504   :  { %v1437_v0 = vadd.f32 %v2474_v63, %v1342_v58  ;;  %v1428_v1 = vpop.f32.mrb[51].mxu1  ;;  %v1490_v3 = vmax.f32 %v1434_v60, 0.0 }
 0x505   :  { %v1429_v2 = vadd.f32 %v1428_v1, %v1342_v58  ;;  %v1488_v5 = vmax.f32 %v1426_v62, 0.0 }
 0x506   :  { %v1491_v4 = vmax.f32 %v1437_v0, 0.0 }
 0x507   :  { %v1489_v6 = vmax.f32 %v1429_v2, 0.0 }
 0x508   :  { %v1505_v7 = vpack.c.bf16 %v1491_v4, %v1490_v3 }
 0x509   :  { %v1504_v8 = vpack.c.bf16 %v1489_v6, %v1488_v5 }
 0x50b   :  { %2503 = vmatprep.mubr.bf16.mxu0 %v1504_v8 }
 0x50c   :  { %2504 = vmatmul.mubr.bf16.vlgmr.msra.gmra.mrb[48].mxu0 %v1505_v7 }
 0x511   :  { %v2477_v9 = vpop.f32.mrb[52].mxu1 }
 0x512   :  { %v1450_v10 = vadd.f32 %v2477_v9, %v1342_v58  ;;  %v1441_v11 = vpop.f32.mrb[53].mxu1 }
 0x513   :  { %v1442_v13 = vadd.f32 %v1441_v11, %v1342_v58  ;;  %v2478_v14 = vpop.f32.mrb[54].mxu1 }
 0x514   :  { %v1453_v15 = vadd.f32 %v2478_v14, %v1342_v58  ;;  %v1444_v23 = vpop.f32.mrb[55].mxu1  ;;  %v1494_v16 = vmax.f32 %v1450_v10, 0.0 }
 0x515   :  { %v1445_v24 = vadd.f32 %v1444_v23, %v1342_v58  ;;  %v1492_v18 = vmax.f32 %v1442_v13, 0.0 }
 0x516   :  { %v1495_v17 = vmax.f32 %v1453_v15, 0.0 }
 0x517   :  { %v1493_v19 = vmax.f32 %v1445_v24, 0.0 }
 0x518   :  { %v1507_v20 = vpack.c.bf16 %v1495_v17, %v1494_v16 }
 0x519   :  { %v1506_v21 = vpack.c.bf16 %v1493_v19, %v1492_v18 }
 0x51b   :  { %2507 = vmatprep.mubr.bf16.mxu0 %v1506_v21 }
 0x51c   :  { %2508 = vmatmul.mubr.bf16.gmra.mrb[52].mxu0 %v1507_v20 }
 0x521   :  { %v2481_v22 = vpop.f32.mrb[56].mxu1 }
 0x522   :  { %v1466_v26 = vadd.f32 %v2481_v22, %v1342_v58  ;;  %v1457_v27 = vpop.f32.mrb[57].mxu1 }
 0x523   :  { %v1458_v28 = vadd.f32 %v1457_v27, %v1342_v58  ;;  %v2482_v29 = vpop.f32.mrb[58].mxu1 }
 0x524   :  { %v1469_v30 = vadd.f32 %v2482_v29, %v1342_v58  ;;  %v1460_v31 = vpop.f32.mrb[59].mxu1  ;;  %v1498_v33 = vmax.f32 %v1466_v26, 0.0 }
 0x525   :  { %v1461_v32 = vadd.f32 %v1460_v31, %v1342_v58  ;;  %v1496_v35 = vmax.f32 %v1458_v28, 0.0 }
 0x526   :  { %v1499_v34 = vmax.f32 %v1469_v30, 0.0 }
 0x527   :  { %v1497_v12 = vmax.f32 %v1461_v32, 0.0 }
 0x528   :  { %v1509_v36 = vpack.c.bf16 %v1499_v34, %v1498_v33 }
 0x529   :  { %v1508_v37 = vpack.c.bf16 %v1497_v12, %v1496_v35 }
 0x52b   :  { %2511 = vmatprep.mubr.bf16.mxu0 %v1508_v37 }
 0x52c   :  { %2512 = vmatmul.mubr.bf16.gmra.mrb[56].mxu0 %v1509_v36 }
 0x531   :  { %v2485_v38 = vpop.f32.mrb[60].mxu1 }
 0x532   :  { %v1482_v39 = vadd.f32 %v2485_v38, %v1342_v58  ;;  %v1473_v40 = vpop.f32.mrb[61].mxu1 }
 0x533   :  { %v1474_v41 = vadd.f32 %v1473_v40, %v1342_v58  ;;  %v2486_v42 = vpop.f32.mrb[62].mxu1 }
 0x534   :  { %v1485_v43 = vadd.f32 %v2486_v42, %v1342_v58  ;;  %v1476_v44 = vpop.f32.mrb[63].mxu1  ;;  %v1502_v46 = vmax.f32 %v1482_v39, 0.0 }
 0x535   :  { %v1477_v45 = vadd.f32 %v1476_v44, %v1342_v58  ;;  %v1500_v48 = vmax.f32 %v1474_v41, 0.0 }
 0x536   :  { %v1503_v47 = vmax.f32 %v1485_v43, 0.0 }
 0x537   :  { %v1501_v49 = vmax.f32 %v1477_v45, 0.0 }
 0x538   :  { %v1511_v50 = vpack.c.bf16 %v1503_v47, %v1502_v46  ;;  %v1714_v47 = vld [vmem:[%s3179_s8 + $0x6] ss:$0 sm:$0xff] }
 0x539   :  { %v1510_v51 = vpack.c.bf16 %v1501_v49, %v1500_v48 }
 0x53b   :  { %2515 = vmatprep.mubr.bf16.mxu0 %v1510_v51 }
 0x53c   :  { %2516 = vmatmul.mubr.bf16.gmra.mrb[60].mxu0 %v1511_v50 }
 0x5df   :  { %v2505_v25 = vpop.f32.mrb[48].mxu0 }
 0x5e0   :  { %v1620_v55 = vadd.f32 %v2505_v25, %v1528_v54  ;;  %v1611_v56 = vpop.f32.mrb[49].mxu0 }
 0x5e1   :  { %v1612_v57 = vadd.f32 %v1611_v56, %v1528_v54  ;;  %v2506_v58 = vpop.f32.mrb[50].mxu0 }
 0x5e2   :  { %v1623_v59 = vadd.f32 %v2506_v58, %v1528_v54  ;;  %v1614_v60 = vpop.f32.mrb[51].mxu0  ;;  %v1676_v62 = vmax.f32 %v1620_v55, 0.0 }
 0x5e3   :  { %v1615_v61 = vadd.f32 %v1614_v60, %v1528_v54  ;;  %v1674_v0 = vmax.f32 %v1612_v57, 0.0 }
 0x5e4   :  { %v1677_v63 = vmax.f32 %v1623_v59, 0.0 }
 0x5e5   :  { %v1675_v1 = vmax.f32 %v1615_v61, 0.0 }
 0x5e6   :  { %v1691_v2 = vpack.c.bf16 %v1677_v63, %v1676_v62 }
 0x5e7   :  { %v1690_v3 = vpack.c.bf16 %v1675_v1, %v1674_v0 }
 0x5e9   :  { %2535 = vmatprep.mubr.bf16.mxu1 %v1690_v3 }
 0x5ea   :  { %2536 = vmatmul.mubr.bf16.vlgmr.msra.gmra.mrb[64].mxu1 %v1691_v2 }
 0x5ef   :  { %v2509_v4 = vpop.f32.mrb[52].mxu0 }
 0x5f0   :  { %v1636_v5 = vadd.f32 %v2509_v4, %v1528_v54  ;;  %v1627_v6 = vpop.f32.mrb[53].mxu0 }
 0x5f1   :  { %v1628_v7 = vadd.f32 %v1627_v6, %v1528_v54  ;;  %v2510_v8 = vpop.f32.mrb[54].mxu0 }
 0x5f2   :  { %v1639_v9 = vadd.f32 %v2510_v8, %v1528_v54  ;;  %v1630_v10 = vpop.f32.mrb[55].mxu0  ;;  %v1680_v13 = vmax.f32 %v1636_v5, 0.0 }
 0x5f3   :  { %v1631_v11 = vadd.f32 %v1630_v10, %v1528_v54  ;;  %v1678_v15 = vmax.f32 %v1628_v7, 0.0 }
 0x5f4   :  { %v1681_v14 = vmax.f32 %v1639_v9, 0.0 }
 0x5f5   :  { %v1679_v23 = vmax.f32 %v1631_v11, 0.0 }
 0x5f6   :  { %v1693_v24 = vpack.c.bf16 %v1681_v14, %v1680_v13 }
 0x5f7   :  { %v1692_v16 = vpack.c.bf16 %v1679_v23, %v1678_v15 }
 0x5f9   :  { %2539 = vmatprep.mubr.bf16.mxu1 %v1692_v16 }
 0x5fa   :  { %2540 = vmatmul.mubr.bf16.gmra.mrb[68].mxu1 %v1693_v24 }
 0x5ff   :  { %v2513_v17 = vpop.f32.mrb[56].mxu0 }
 0x600   :  { %v1652_v18 = vadd.f32 %v2513_v17, %v1528_v54  ;;  %v1643_v19 = vpop.f32.mrb[57].mxu0 }
 0x601   :  { %v1644_v20 = vadd.f32 %v1643_v19, %v1528_v54  ;;  %v2514_v21 = vpop.f32.mrb[58].mxu0 }
 0x602   :  { %v1655_v22 = vadd.f32 %v2514_v21, %v1528_v54  ;;  %v1646_v26 = vpop.f32.mrb[59].mxu0  ;;  %v1684_v28 = vmax.f32 %v1652_v18, 0.0 }
 0x603   :  { %v1647_v27 = vadd.f32 %v1646_v26, %v1528_v54  ;;  %v1682_v30 = vmax.f32 %v1644_v20, 0.0 }
 0x604   :  { %v1685_v29 = vmax.f32 %v1655_v22, 0.0 }
 0x605   :  { %v1683_v31 = vmax.f32 %v1647_v27, 0.0 }
 0x606   :  { %v1695_v32 = vpack.c.bf16 %v1685_v29, %v1684_v28 }
 0x607   :  { %v1694_v33 = vpack.c.bf16 %v1683_v31, %v1682_v30 }
 0x609   :  { %2543 = vmatprep.mubr.bf16.mxu1 %v1694_v33 }
 0x60a   :  { %2544 = vmatmul.mubr.bf16.gmra.mrb[72].mxu1 %v1695_v32 }
 0x60f   :  { %v2517_v34 = vpop.f32.mrb[60].mxu0 }
 0x610   :  { %v1668_v35 = vadd.f32 %v2517_v34, %v1528_v54  ;;  %v1659_v12 = vpop.f32.mrb[61].mxu0 }
 0x611   :  { %v1660_v36 = vadd.f32 %v1659_v12, %v1528_v54  ;;  %v2518_v37 = vpop.f32.mrb[62].mxu0 }
 0x612   :  { %v1671_v38 = vadd.f32 %v2518_v37, %v1528_v54  ;;  %v1662_v39 = vpop.f32.mrb[63].mxu0  ;;  %v1688_v41 = vmax.f32 %v1668_v35, 0.0 }
 0x613   :  { %v1663_v40 = vadd.f32 %v1662_v39, %v1528_v54  ;;  %v1686_v43 = vmax.f32 %v1660_v36, 0.0 }
 0x614   :  { %v1689_v42 = vmax.f32 %v1671_v38, 0.0 }
 0x615   :  { %v1687_v44 = vmax.f32 %v1663_v40, 0.0 }
 0x616   :  { %v1697_v45 = vpack.c.bf16 %v1689_v42, %v1688_v41 }
 0x617   :  { %v1696_v46 = vpack.c.bf16 %v1687_v44, %v1686_v43 }
 0x619   :  { %2547 = vmatprep.mubr.bf16.mxu1 %v1696_v46 }
 0x61a   :  { %2548 = vmatmul.mubr.bf16.gmra.mrb[76].mxu1 %v1697_v45 }
 0x6bd   :  { %v2537_v48 = vpop.f32.mrb[64].mxu1 }
 0x6be   :  { %v1797_v49 = vpop.f32.mrb[65].mxu1 }
 0x6bf   :  { %v1798_v50 = vadd.f32 %v1797_v49, %v1714_v47  ;;  %v2538_v51 = vpop.f32.mrb[66].mxu1 }
 0x6c0   :  { %v1800_v52 = vpop.f32.mrb[67].mxu1 }
 0x6c1   :  { %v1801_v53 = vadd.f32 %v1800_v52, %v1714_v47  ;;  %v1860_v25 = vmax.f32 %v1798_v50, 0.0 }
 0x6c3   :  { %v1861_v54 = vmax.f32 %v1801_v53, 0.0 }
 0x6c5   :  { %v1876_v55 = vpack.c.bf16 %v1861_v54, %v1860_v25 }
 0x6c7   :  { %2231 = vst.sshfl [vmem:[#allocation12] sm:$0x3 pattern:$0x76325410] %v1876_v55 }
 0x6cd   :  { %v2541_v56 = vpop.f32.mrb[68].mxu1 }
 0x6ce   :  { %v2109_v57 = vld [vmem:[#allocation12] sm:$0x3]  ;;  %v1813_v58 = vpop.f32.mrb[69].mxu1 }
 0x6cf   :  { %2110 = vst [vmem:[%s3180_s9] sm:$0x3] %v2109_v57  ;;  %v2542_v59 = vpop.f32.mrb[70].mxu1 }
 0x6d0   :  { %v1816_v60 = vpop.f32.mrb[71].mxu1 }
 0x6dd   :  { %v2545_v61 = vpop.f32.mrb[72].mxu1 }
 0x6de   :  { %v1829_v62 = vpop.f32.mrb[73].mxu1 }
 0x6df   :  { %v2546_v63 = vpop.f32.mrb[74].mxu1 }
 0x6e0   :  { %v1832_v0 = vpop.f32.mrb[75].mxu1 }
 0x6ed   :  { %v2549_v1 = vpop.f32.mrb[76].mxu1 }
 0x6ee   :  { %v1845_v2 = vpop.f32.mrb[77].mxu1 }
 0x6ef   :  { %v2550_v3 = vpop.f32.mrb[78].mxu1 }
 0x6f0   :  { %v1848_v4 = vpop.f32.mrb[79].mxu1 }
 0x6f1   :  { %2127 = vsyncpa [#allocation3], 1 }
 0x6f2   :  { %2128 = vsyncpa [#allocation5], 1 }
 0x6f3   :  { %2129 = vsyncpa [#allocation8], 1 }
 0x6f4   :  { %2130 = vsyncpa [#allocation11], 1 }

</bundles_post_ra>
